<compile_context>
chip_gen: v7x
topology: tpu7x:2x2x1
jax: 0.10.0
libtpu: 0.0.40
codegen_flags: <defaults>
</compile_context>

<pallas_src>
from functools import partial

import jax
import jax.numpy as jnp
from jax.experimental import pallas as pl
from jax.experimental.pallas import tpu as pltpu

_EPS = 1e-5
_LANE = 128
_MIB = 1 << 20
_REF_PREC = jax.lax.Precision.HIGHEST  # used only by the pure-JAX reference


def _pick_tile(m, target):
    """Largest multiple-of-8 divisor of m that is <= target (fallback: m)."""
    t = min(target, m)
    t -= t % 8
    while t >= 8:
        if m % t == 0:
            return t
        t -= 8
    return m


def _compiler_params(dims, est_bytes):
    # Explicit scoped-VMEM limit sized from the actual block + scratch bytes,
    # clamped to [32 MiB, 48 MiB] so it is valid on v5e/v6e (128 MiB physical)
    # and v7x (64 MiB physical).
    limit = int(min(48 * _MIB, max(32 * _MIB, 2 * est_bytes + 4 * _MIB)))
    return pltpu.CompilerParams(dimension_semantics=dims,
                                vmem_limit_bytes=limit)


# ---------------------------------------------------------------------------
# Kernel 1: pointwise (1x1x1) conv as bf16 matmul, optionally fusing the
#           previous stage's BN-affine + PReLU into the input load path,
#           emitting per-block partial BN stats and a bf16 output.
# ---------------------------------------------------------------------------
def _pw_conv_kernel(fuse_in_bn, x_ref, *rest):
    if fuse_in_bn:
        sc_ref, bi_ref, alpha_ref, w_ref, y_ref, sum_ref, sq_ref = rest
    else:
        w_ref, y_ref, sum_ref, sq_ref = rest

    x = x_ref[...]
    if fuse_in_bn:
        z = x.astype(jnp.float32) * sc_ref[...] + bi_ref[...]
        a = alpha_ref[0]
        x = jnp.where(z > 0, z, a * z)

    y = jnp.dot(x.astype(jnp.bfloat16), w_ref[...],
                preferred_element_type=jnp.float32)
    y_ref[...] = y.astype(y_ref.dtype)
    # per-grid-block partial BN stats (reduced in the wrapper) -> fully
    # parallel grid, stats taken from the f32 accumulator (not the bf16 store).
    sum_ref[0] = jnp.sum(y, axis=0, keepdims=True)
    sq_ref[0] = jnp.sum(y * y, axis=0, keepdims=True)


def pointwise_conv_stats(x2d, w_bf16, scale=None, bias=None, alpha=None,
                         tm=1024):
    M, Cin = x2d.shape
    Cout = w_bf16.shape[1]
    tm = _pick_tile(M, tm)
    nblk = M // tm
    fuse = scale is not None

    vmem_full = pl.BlockSpec(memory_space=pltpu.MemorySpace.VMEM)
    smem_full = pl.BlockSpec(memory_space=pltpu.MemorySpace.SMEM)

    inputs = [x2d]
    in_specs = [pl.BlockSpec((tm, Cin), lambda i: (i, 0))]
    if fuse:
        inputs += [scale, bias, alpha]
        in_specs += [vmem_full, vmem_full, smem_full]
    inputs.append(w_bf16)
    in_specs.append(vmem_full)   # single-buffered whole weight in VMEM

    est = (2 * tm * Cin * x2d.dtype.itemsize   # double-buffered input block
           + 2 * tm * Cout * 2                 # double-buffered bf16 output
           + Cin * Cout * 2                    # single-buffered weight
           + 16 * Cout * 4)                    # scale/bias/stat blocks

    return pl.pallas_call(
        partial(_pw_conv_kernel, fuse),
        out_shape=(jax.ShapeDtypeStruct((M, Cout), jnp.bfloat16),
                   jax.ShapeDtypeStruct((nblk, 1, Cout), jnp.float32),
                   jax.ShapeDtypeStruct((nblk, 1, Cout), jnp.float32)),
        grid=(nblk,),
        in_specs=in_specs,
        out_specs=(pl.BlockSpec((tm, Cout), lambda i: (i, 0)),
                   pl.BlockSpec((1, 1, Cout), lambda i: (i, 0, 0)),
                   pl.BlockSpec((1, 1, Cout), lambda i: (i, 0, 0))),
        compiler_params=_compiler_params(("parallel",), est),
    )(*inputs)


# ---------------------------------------------------------------------------
# Kernel 2: grouped 3x3x3 conv (stride 1, pad 1), D-tiled grid=(N, n_d_tiles),
#           fused BN+PReLU on the input, halo staged via manual DMA from a raw
#           HBM ref into a guarded flat bf16 VMEM buffer, 27 contiguous-slice
#           taps accumulated into an f32 VMEM scratch, per-(n, d-tile) stats.
# ---------------------------------------------------------------------------
def _gconv_kernel(x_hbm, sc_ref, bi_ref, alpha_ref, w_ref,
                  y_ref, sum_ref, sq_ref, buf_ref, acc_ref, sem,
                  *, H, W, tD, G):
    HW = H * W
    tDHW = tD * HW
    C = buf_ref.shape[-1]
    base = G + HW                     # first interior row inside buf

    n = pl.program_id(0)
    dt = pl.program_id(1)
    nd = pl.num_programs(1)
    d0 = dt * tD

    # ---- stage the (tD + 2)-plane window HBM -> VMEM (interior + D halo) ----
    lo_src = pl.multiple_of((d0 - 1) * HW, HW)
    mid_src = pl.multiple_of(d0 * HW, HW)
    hi_src = pl.multiple_of((d0 + tD) * HW, HW)

    interior = pltpu.make_async_copy(
        x_hbm.at[n, pl.ds(mid_src, tDHW), :],
        buf_ref.at[pl.ds(base, tDHW), :], sem.at[0])
    interior.start()

    @pl.when(dt > 0)
    def _():
        pltpu.make_async_copy(x_hbm.at[n, pl.ds(lo_src, HW), :],
                              buf_ref.at[pl.ds(G, HW), :], sem.at[1]).start()

    @pl.when(dt < nd - 1)
    def _():
        pltpu.make_async_copy(x_hbm.at[n, pl.ds(hi_src, HW), :],
                              buf_ref.at[pl.ds(base + tDHW, HW), :],
                              sem.at[2]).start()

    interior.wait()

    @pl.when(dt > 0)
    def _():
        pltpu.make_async_copy(x_hbm.at[n, pl.ds(lo_src, HW), :],
                              buf_ref.at[pl.ds(G, HW), :], sem.at[1]).wait()

    @pl.when(dt < nd - 1)
    def _():
        pltpu.make_async_copy(x_hbm.at[n, pl.ds(hi_src, HW), :],
                              buf_ref.at[pl.ds(base + tDHW, HW), :],
                              sem.at[2]).wait()

    # ---- fused BN-affine + PReLU of the previous stage, applied in place ----
    z = buf_ref[G:G + (tD + 2) * HW, :].astype(jnp.float32)
    z = z * sc_ref[...] + bi_ref[...]
    a = alpha_ref[0]
    buf_ref[G:G + (tD + 2) * HW, :] = jnp.where(z > 0, z, a * z).astype(
        jnp.bfloat16)

    # zero the D-halo planes at the volume boundary AFTER BN+PReLU so the
    # conv's zero padding is a true zero in activation space.
    @pl.when(dt == 0)
    def _():
        buf_ref[G:G + HW, :] = jnp.zeros((HW, C), jnp.bfloat16)

    @pl.when(dt == nd - 1)
    def _():
        buf_ref[base + tDHW:base + tDHW + HW, :] = jnp.zeros((HW, C),
                                                             jnp.bfloat16)

    # ---- 27 contiguous-slice taps; wrap-around rows along H/W masked out ----
    row = jax.lax.broadcasted_iota(jnp.int32, (tDHW, 1), 0)
    hh = (row // W) % H
    ww = row % W
    h_ok = {0: hh >= 1, 1: None, 2: hh < H - 1}
    w_ok = {0: ww >= 1, 1: None, 2: ww < W - 1}

    first = True
    for kd in range(3):
        for kh in range(3):
            for kw in range(3):
                off = base + (kd - 1) * HW + (kh - 1) * W + (kw - 1)
                xs = buf_ref[off:off + tDHW, :]
                mask = h_ok[kh]
                if w_ok[kw] is not None:
                    mask = w_ok[kw] if mask is None else (mask & w_ok[kw])
                if mask is not None:
                    xs = jnp.where(mask, xs, 0.0)
                contrib = jnp.dot(xs, w_ref[kd, kh, kw],
                                  preferred_element_type=jnp.float32)
                if first:
                    acc_ref[...] = contrib      # first tap: assign, no zero-init
                    first = False
                else:
                    acc_ref[...] += contrib

    acc = acc_ref[...]
    y_ref[0] = acc.astype(y_ref.dtype)
    sum_ref[0, 0] = jnp.sum(acc, axis=0, keepdims=True)
    sq_ref[0, 0] = jnp.sum(acc * acc, axis=0, keepdims=True)


def grouped_conv_stats(y_prev, w_bf16, scale, bias, alpha, D, H, W, d_tile=4):
    # y_prev: (N, D*H*W, C) bf16 -- raw conv1 output; BN1+PReLU applied in-kernel.
    N, DHW, C = y_prev.shape
    Cout = w_bf16.shape[-1]
    HW = H * W
    assert DHW == D * HW
    assert HW % 8 == 0, "H*W must be a multiple of 8 for the flat-row layout"

    tD = max(1, min(d_tile, D))
    while D % tD:
        tD -= 1
    nd = D // tD
    # spill guard: only read under the h/w wrap masks -> never zero-filled.
    G = max(16, ((W + 1 + 15) // 16) * 16)
    buf_rows = (tD + 2) * HW + 2 * G

    vmem_full = pl.BlockSpec(memory_space=pltpu.MemorySpace.VMEM)
    smem_full = pl.BlockSpec(memory_space=pltpu.MemorySpace.SMEM)

    est = (buf_rows * C * 2                # bf16 staging buffer
           + tD * HW * Cout * 4            # f32 accumulator
           + 2 * tD * HW * Cout * 2        # double-buffered bf16 output block
           + 27 * C * Cout * 2             # single-buffered 3x3x3 weight
           + 16 * Cout * 4)

    kern = partial(_gconv_kernel, H=H, W=W, tD=tD, G=G)
    return pl.pallas_call(
        kern,
        out_shape=(jax.ShapeDtypeStruct((N, DHW, Cout), jnp.bfloat16),
                   jax.ShapeDtypeStruct((N, nd, 1, Cout), jnp.float32),
                   jax.ShapeDtypeStruct((N, nd, 1, Cout), jnp.float32)),
        grid=(N, nd),
        in_specs=[pl.BlockSpec(memory_space=pl.ANY),   # raw HBM, manual DMA
                  vmem_full, vmem_full, smem_full, vmem_full],
        out_specs=(pl.BlockSpec((1, tD * HW, Cout), lambda n, d: (n, d, 0)),
                   pl.BlockSpec((1, 1, 1, Cout), lambda n, d: (n, d, 0, 0)),
                   pl.BlockSpec((1, 1, 1, Cout), lambda n, d: (n, d, 0, 0))),
        scratch_shapes=[pltpu.VMEM((buf_rows, C), jnp.bfloat16),
                        pltpu.VMEM((tD * HW, Cout), jnp.float32),
                        pltpu.SemaphoreType.DMA((3,))],
        compiler_params=_compiler_params(("parallel", "parallel"), est),
    )(y_prev, scale, bias, alpha, w_bf16)


# ---------------------------------------------------------------------------
# Kernel 3: final BN-affine + residual add + PReLU (lane-dense elementwise)
# ---------------------------------------------------------------------------
def _bn_res_prelu_kernel(y_ref, r_ref, sc_ref, bi_ref, alpha_ref, o_ref):
    z = y_ref[...].astype(jnp.float32) * sc_ref[...] + bi_ref[...] + r_ref[...]
    a = alpha_ref[0]
    o_ref[...] = jnp.where(z > 0, z, a * z)


def bn_residual_prelu(y2d, resid, scale, bias, alpha, tm=2048):
    M, C = y2d.shape
    tm = _pick_tile(M, tm)
    vmem_full = pl.BlockSpec(memory_space=pltpu.MemorySpace.VMEM)
    smem_full = pl.BlockSpec(memory_space=pltpu.MemorySpace.SMEM)
    est = 2 * tm * C * (2 + 4 + 4) + 16 * C * 4
    return pl.pallas_call(
        _bn_res_prelu_kernel,
        out_shape=jax.ShapeDtypeStruct((M, C), jnp.float32),
        grid=(M // tm,),
        in_specs=[pl.BlockSpec((tm, C), lambda i: (i, 0)),
                  pl.BlockSpec((tm, C), lambda i: (i, 0)),
                  vmem_full, vmem_full, smem_full],
        out_specs=pl.BlockSpec((tm, C), lambda i: (i, 0)),
        compiler_params=_compiler_params(("parallel",), est),
    )(y2d, resid, scale, bias, alpha)


# ---------------------------------------------------------------------------
# Glue: BN scale/bias from the partial stats (training-mode, biased variance)
# TODO(synk): E[y^2]-E[y]^2 in f32 can cancel when |mean| >> std; a shifted /
#   Welford-style combine of the per-block partials would be more robust.
# ---------------------------------------------------------------------------
def bn_scale_bias(sum_part, sq_part, count, gamma, beta, eps=_EPS):
    c = sum_part.shape[-1]
    s = sum_part.reshape(-1, c).sum(axis=0, keepdims=True)
    q = sq_part.reshape(-1, c).sum(axis=0, keepdims=True)
    mean = s / count
    var = jnp.maximum(q / count - mean * mean, 0.0)
    inv = jax.lax.rsqrt(var + eps)
    scale = gamma.reshape(1, -1) * inv
    bias = beta.reshape(1, -1) - mean * scale
    return scale, bias


# ---------------------------------------------------------------------------
# Full forward (channels-last, lane-padded), parameters already in kernel layout
# ---------------------------------------------------------------------------
def resnet_bottleneck_forward(x_ndhwc, p, d_tile=4):
    N, D, H, W, Cin = x_ndhwc.shape
    M = N * D * H * W
    Cpl = p["w1"].shape[1]
    x2d = x_ndhwc.reshape(M, Cin)

    # conv1 (1x1x1) -> BN1 stats
    y1, s1, q1 = pointwise_conv_stats(x2d, p["w1"])
    sc1, b1 = bn_scale_bias(s1, q1, M, p["g1"], p["b1"])

    # [BN1+PReLU fused on input] -> grouped 3x3x3 conv (D-tiled) -> BN2 stats
    y2, s2, q2 = grouped_conv_stats(y1.reshape(N, D * H * W, Cpl), p["w2"],
                                    sc1, b1, p["alpha"], D, H, W,
                                    d_tile=d_tile)
    sc2, b2 = bn_scale_bias(s2, q2, M, p["g2"], p["b2"])

    # [BN2+PReLU fused on input] -> conv3 (1x1x1) -> BN3 stats
    y3, s3, q3 = pointwise_conv_stats(y2.reshape(M, Cpl), p["w3"],
                                      scale=sc2, bias=b2, alpha=p["alpha"])
    sc3, b3 = bn_scale_bias(s3, q3, M, p["g3"], p["b3"])

    # BN3 affine + residual add + PReLU
    out = bn_residual_prelu(y3, x2d, sc3, b3, p["alpha"])
    return out.reshape(N, D, H, W, -1)


# ---------------------------------------------------------------------------
# Pure-JAX reference (PyTorch semantics, NCDHW layout, f32 HIGHEST)
# ---------------------------------------------------------------------------
def reference_forward(x, w1, w2, w3, g1, b1, g2, b2, g3, b3, alpha, cardinality):
    def conv(xx, ww, pad, groups=1):
        return jax.lax.conv_general_dilated(
            xx, ww, window_strides=(1, 1, 1), padding=[(pad, pad)] * 3,
            dimension_numbers=("NCDHW", "OIDHW", "NCDHW"),
            feature_group_count=groups, precision=_REF_PREC)

    def bn(xx, g, b):
        mean = jnp.mean(xx, axis=(0, 2, 3, 4), keepdims=True)
        var = jnp.mean((xx - mean) ** 2, axis=(0, 2, 3, 4), keepdims=True)
        xh = (xx - mean) / jnp.sqrt(var + _EPS)
        return g.reshape(1, -1, 1, 1, 1) * xh + b.reshape(1, -1, 1, 1, 1)

    def prelu(xx):
        return jnp.where(xx > 0, xx, alpha * xx)

    out = prelu(bn(conv(x, w1, 0), g1, b1))
    out = prelu(bn(conv(out, w2, 1, cardinality), g2, b2))
    out = bn(conv(out, w3, 0), g3, b3)
    out = out + x
    return prelu(out)


if __name__ == "__main__":
    # ResNetBottleneck(inplanes=8, planes=4, cardinality=2, stride=1);
    # expansion=2 so inplanes == 2*planes and the residual add type-checks.
    # Non-cubic volume (D != H = W) and d_tile=4 -> 3 D-tiles, exercising the
    # first / middle / last halo cases of the D-tiled grouped conv.
    N, planes, cardinality = 2, 4, 2
    inplanes = planes * 2
    D, H, W = 12, 8, 8
    alpha = 0.25  # PReLU default init

    keys = jax.random.split(jax.random.PRNGKey(0), 10)
    x_ncdhw = jax.random.normal(keys[0], (N, inplanes, D, H, W), jnp.float32)

    # Deterministic synthetic parameters (PyTorch weight layouts)
    w1 = 0.2 * jax.random.normal(keys[1], (planes, inplanes, 1, 1, 1), jnp.float32)
    w2 = 0.1 * jax.random.normal(keys[2], (planes, planes // cardinality, 3, 3, 3), jnp.float32)
    w3 = 0.2 * jax.random.normal(keys[3], (planes * 2, planes, 1, 1, 1), jnp.float32)
    g1 = 1.0 + 0.1 * jax.random.normal(keys[4], (planes,), jnp.float32)
    b1 = 0.1 * jax.random.normal(keys[5], (planes,), jnp.float32)
    g2 = 1.0 + 0.1 * jax.random.normal(keys[6], (planes,), jnp.float32)
    b2 = 0.1 * jax.random.normal(keys[7], (planes,), jnp.float32)
    g3 = 1.0 + 0.1 * jax.random.normal(keys[8], (planes * 2,), jnp.float32)
    b3 = 0.1 * jax.random.normal(keys[9], (planes * 2,), jnp.float32)

    # ---- convert parameters to kernel layout (channels-last, lane-padded) ----
    def rup(c):
        return ((c + _LANE - 1) // _LANE) * _LANE

    def pad2(a, r, c):
        return jnp.pad(a, ((0, r - a.shape[0]), (0, c - a.shape[1])))

    def pad1(a, c):
        return jnp.pad(a, ((0, c - a.shape[0]),))

    Cin_p, Cpl_p, Cout_p = rup(inplanes), rup(planes), rup(planes * 2)

    w1_mat = pad2(w1.reshape(planes, inplanes).T, Cin_p, Cpl_p).astype(jnp.bfloat16)
    w3_mat = pad2(w3.reshape(planes * 2, planes).T, Cpl_p, Cout_p).astype(jnp.bfloat16)

    # dense (group-block-diagonal) 3x3x3 weight, (kd,kh,kw,Cin,Cout), lane-padded
    # TODO(synk): at production group widths (>=128 ch/group) use per-group
    # matmuls over contiguous channel slices instead of this dense block-diag.
    ipg = planes // cardinality
    opg = planes // cardinality
    w2_dense = jnp.zeros((3, 3, 3, Cpl_p, Cpl_p), jnp.float32)
    for g in range(cardinality):
        blk = jnp.transpose(w2[g * opg:(g + 1) * opg], (2, 3, 4, 1, 0))
        w2_dense = w2_dense.at[:, :, :, g * ipg:(g + 1) * ipg,
                               g * opg:(g + 1) * opg].set(blk)
    w2_dense = w2_dense.astype(jnp.bfloat16)

    params = dict(
        w1=w1_mat, w2=w2_dense, w3=w3_mat,
        g1=pad1(g1, Cpl_p), b1=pad1(b1, Cpl_p),
        g2=pad1(g2, Cpl_p), b2=pad1(b2, Cpl_p),
        g3=pad1(g3, Cout_p), b3=pad1(b3, Cout_p),
        alpha=jnp.array([alpha], jnp.float32))

    # NCDHW (PyTorch) -> NDHWC, channel zero-padded to the lane width
    # (a no-op at production channel counts).
    x_ndhwc = jnp.transpose(x_ncdhw, (0, 2, 3, 4, 1))
    x_ndhwc = jnp.pad(x_ndhwc, ((0, 0),) * 4 + ((0, Cin_p - inplanes),))

    out_ndhwc = resnet_bottleneck_forward(x_ndhwc, params, d_tile=4)
    out_ndhwc = jax.block_until_ready(out_ndhwc)
    out_ncdhw = jnp.transpose(out_ndhwc[..., :inplanes], (0, 4, 1, 2, 3))

    ref = reference_forward(x_ncdhw, w1, w2, w3, g1, b1, g2, b2, g3, b3,
                            alpha, cardinality)
    ref = jax.block_until_ready(ref)

    max_err = float(jnp.max(jnp.abs(out_ncdhw - ref)))
    mean_err = float(jnp.mean(jnp.abs(out_ncdhw - ref)))
    assert out_ncdhw.shape == (N, inplanes, D, H, W)
    # bf16 MXU matmuls + bf16 HBM intermediates vs the f32/HIGHEST reference:
    # rounding error only (a tap/mask indexing bug would be O(1), not O(0.1)).
    assert max_err < 1.2e-1, f"mismatch vs reference: max|diff|={max_err}"
    assert mean_err < 2.5e-2, f"mismatch vs reference: mean|diff|={mean_err}"
    print("KERNEL_OK")
</pallas_src>

<mosaic_0001>
module attributes {stable_mosaic.version = 11 : i64} {
  func.func @_pw_conv_kernel(%arg0: i32, %arg1: memref<768x128xf32, #tpu.memory_space<vmem>>, %arg2: memref<128x128xbf16, #tpu.memory_space<vmem>>, %arg3: memref<768x128xbf16, #tpu.memory_space<vmem>>, %arg4: memref<1x1x128xf32, #tpu.memory_space<vmem>>, %arg5: memref<1x1x128xf32, #tpu.memory_space<vmem>>) attributes {dimension_semantics = [#tpu.dimension_semantics<parallel>], iteration_bounds = array<i64: 2>, scalar_prefetch = 0 : i64, scratch_operands = 0 : i64, tpu.core_type = #tpu.core_type<tc>, window_params = [{transform_indices = @transform_0, window_bounds = array<i64: 768, 128>}, {pipeline_mode = #tpu.pipeline_mode<synchronous>, transform_indices = @transform_1, window_bounds = array<i64: 128, 128>}, {transform_indices = @transform_2, window_bounds = array<i64: 768, 128>}, {transform_indices = @transform_3, window_bounds = array<i64: 1, 1, 128>}, {transform_indices = @transform_4, window_bounds = array<i64: 1, 1, 128>}]} {
    %c0 = arith.constant 0 : index
    %c0_0 = arith.constant 0 : index
    %0 = vector.load %arg1[%c0, %c0_0] : memref<768x128xf32, #tpu.memory_space<vmem>>, vector<768x128xf32>
    %1 = arith.truncf %0 : vector<768x128xf32> to vector<768x128xbf16>
    %c0_1 = arith.constant 0 : index
    %c0_2 = arith.constant 0 : index
    %2 = vector.load %arg2[%c0_1, %c0_2] : memref<128x128xbf16, #tpu.memory_space<vmem>>, vector<128x128xbf16>
    %cst = arith.constant dense<0.000000e+00> : vector<768x128xf32>
    %3 = tpu.matmul %1, %2, %cst {dimension_numbers = #tpu.dot_dimension_numbers<[1], [0], [0], [1], [0, 0, 1, 1], [], []>} : vector<768x128xbf16>, vector<128x128xbf16>, vector<768x128xf32> -> vector<768x128xf32>
    %4 = arith.truncf %3 : vector<768x128xf32> to vector<768x128xbf16>
    %c0_3 = arith.constant 0 : index
    %c0_4 = arith.constant 0 : index
    %5 = vector.load %arg3[%c0_3, %c0_4] : memref<768x128xbf16, #tpu.memory_space<vmem>>, vector<768x128xbf16>
    tpu.vector_store %arg3[%c0_3, %c0_4], %4 {strides = array<i32>} : memref<768x128xbf16, #tpu.memory_space<vmem>>, vector<768x128xbf16>,
    %cst_5 = arith.constant dense<0.000000e+00> : vector<128xf32>
    %6 = vector.multi_reduction <add>, %3, %cst_5 [0] : vector<768x128xf32> to vector<128xf32>
    %7 = vector.shape_cast %6 : vector<128xf32> to vector<1x128xf32>
    %c0_6 = arith.constant 0 : index
    %c0_7 = arith.constant 0 : index
    %c0_8 = arith.constant 0 : index
    %8 = vector.load %arg4[%c0_6, %c0_7, %c0_8] : memref<1x1x128xf32, #tpu.memory_space<vmem>>, vector<1x1x128xf32>
    %9 = vector.shape_cast %8 : vector<1x1x128xf32> to vector<1x128xf32>
    %10 = vector.shape_cast %7 : vector<1x128xf32> to vector<1x1x128xf32>
    tpu.vector_store %arg4[%c0_6, %c0_7, %c0_8], %10 {strides = array<i32>} : memref<1x1x128xf32, #tpu.memory_space<vmem>>, vector<1x1x128xf32>,
    %11 = arith.mulf %3, %3 : vector<768x128xf32>
    %cst_9 = arith.constant dense<0.000000e+00> : vector<128xf32>
    %12 = vector.multi_reduction <add>, %11, %cst_9 [0] : vector<768x128xf32> to vector<128xf32>
    %13 = vector.shape_cast %12 : vector<128xf32> to vector<1x128xf32>
    %c0_10 = arith.constant 0 : index
    %c0_11 = arith.constant 0 : index
    %c0_12 = arith.constant 0 : index
    %14 = vector.load %arg5[%c0_10, %c0_11, %c0_12] : memref<1x1x128xf32, #tpu.memory_space<vmem>>, vector<1x1x128xf32>
    %15 = vector.shape_cast %14 : vector<1x1x128xf32> to vector<1x128xf32>
    %16 = vector.shape_cast %13 : vector<1x128xf32> to vector<1x1x128xf32>
    tpu.vector_store %arg5[%c0_10, %c0_11, %c0_12], %16 {strides = array<i32>} : memref<1x1x128xf32, #tpu.memory_space<vmem>>, vector<1x1x128xf32>,
    return
  }
  func.func @transform_0(%arg0: i32) -> (i32, i32) {
    %c0_i32 = arith.constant 0 : i32
    %c0_i32_0 = arith.constant 0 : i32
    return %arg0, %c0_i32 : i32, i32
  }
  func.func @transform_1(%arg0: i32) -> (i32, i32) {
    %c0_i32 = arith.constant 0 : i32
    %c0_i32_0 = arith.constant 0 : i32
    %c0_i32_1 = arith.constant 0 : i32
    return %c0_i32, %c0_i32_0 : i32, i32
  }
  func.func @transform_2(%arg0: i32) -> (i32, i32) {
    %c0_i32 = arith.constant 0 : i32
    %c0_i32_0 = arith.constant 0 : i32
    return %arg0, %c0_i32 : i32, i32
  }
  func.func @transform_3(%arg0: i32) -> (i32, i32, i32) {
    %c0_i32 = arith.constant 0 : i32
    %c0_i32_0 = arith.constant 0 : i32
    %c0_i32_1 = arith.constant 0 : i32
    return %arg0, %c0_i32, %c0_i32_0 : i32, i32, i32
  }
  func.func @transform_4(%arg0: i32) -> (i32, i32, i32) {
    %c0_i32 = arith.constant 0 : i32
    %c0_i32_0 = arith.constant 0 : i32
    %c0_i32_1 = arith.constant 0 : i32
    return %arg0, %c0_i32, %c0_i32_0 : i32, i32, i32
  }
}

</mosaic_0001>

<bundles_post_ra>
// kernel: tpu_custom_call.1
= control target key start
LH: loop header
LB: loop body
LE: loop exit
PB: predicated region body
PF: predicated region fallthrough
CT: control target
= control target key end

     0   :  { %10 = vsyncpa [#allocation3], 0  ;;  %s3545_s0 = inlined_call_operand.hbm [shape: f32[1536,128], index: 0, kind: input, shape index: {}]   ;;  %s3546_s1 = inlined_call_operand.hbm [shape: bf16[128,128], index: 1, kind: input, shape index: {}]   ;;  %s3547_s2 = inlined_call_operand.hbm [shape: bf16[1536,128], index: 2, kind: output, shape index: {0}]   ;;  %s3548_s3 = inlined_call_operand.hbm [shape: f32[2,1,128], index: 3, kind: output, shape index: {1}]   ;;  %s3549_s4 = inlined_call_operand.hbm [shape: f32[2,1,128], index: 4, kind: output, shape index: {2}]  }
   0x1   :  { %12 = vsyncpa [#allocation3 + $0x1], 0 }
   0x2   :  { %13 = vsyncpa [#allocation6], 0 }
   0x3   :  { %14 = vsyncpa [#allocation4], 0 }
   0x4   :  { %16 = vsyncpa [#allocation4 + $0x1], 0 }
   0x5   :  { %17 = vsyncpa [#allocation9], 0 }
   0x6   :  { %19 = vsyncpa [#allocation9 + $0x1], 0  ;;  %s2834_s15 = smov 0   ;;  %s2836_s16 = smov 0  }
   0x7   :  { %s2838_s17 = smov 0   ;;  %s2840_s18 = smov 0  }
   0x8 LB: > { %s2855_s19 = sadd.s32 4294967295, %s2796_s18   ;;  %s1839_s20 = sadd.s32 4294967294, %s2796_s18   ;;  %s2796_s18 = sphi %s2840_s18, %s3573_s18   ;;  %s2792_s17 = sphi %s2838_s17, %s3572_s17   ;;  %s2788_s16 = sphi %s2836_s16, %s3571_s16   ;;  %s2784_s15 = sphi %s2834_s15, %s3570_s15  }
   0x9   : > { %p45_p0 = scmp.ne.s32.totalorder %s2788_s16, %s2784_s15  ;;  %p3550_p1 = scmp.eq.s32.totalorder %s2855_s19, 0 }
   0xa   : > { %p96_p3 = scmp.eq.s32.totalorder %s1839_s20, 1  ;;  %p1840_p5 = scmp.ge.s32.totalorder %s2796_s18, 1 }
   0xb   : > { %p2866_p4 = por %p3550_p1, %p45_p0  ;;  %p155_p7 = scmp.lt.s32.totalorder %s2796_s18, 3 }
   0xc   : > { %p2871_p6 = por %p96_p3, %p45_p0  ;;  %s2798_s24 = smov [#allocation5]  }
   0xd   : > { %s3555_s21 = scalar_select %p2866_p4, 1, 0 }
   0xe   : > { %s3556_s22 = scalar_select %p2871_p6, 1, 0 }
   0xf   : > { %p2876_p8 = pnand %p1840_p5, %p155_p7  ;;  %s167_s25 = sshll.u32 %s2798_s24, 4  ;;  %s2880_s25 = int_to_ptr.vmem [resolvable:$true] %s167_s25 }
  0x10   : > { %s2892_s27 = sadd.s32 1, %s2796_s18   ;;  %s32_s28 = sadd.s32 1, %s2792_s17 }
  0x11   : > { %s3557_s23 = scalar_select %p2876_p8, 1, 0 }
  0x12   : > { %p2539_p9 = pneg %p2876_p8  ;;  %s29_s29 = ssub.s32 %s2796_s18, %s2892_s27 }
  0x13   : > { %s2608_s6 = scalar_lea.hbm %s3546_s1, 1024 }
  0x14   : > { %p2887_p11 = pnand %p2539_p9, %p3550_p1  ;;  %p2609_p12 = scmp.ne.s32.totalorder %s3546_s1, %s2608_s6 }
  0x15   : > { %p2615_p5 = scmp.lt.u32.totalorder %s2608_s6, %s3546_s1 }
  0x16   : > { %p2610_p13 = pneg %p2887_p11 }
  0x18   : > { %p2611_p0 = pnand %p2610_p13, %p2609_p12 }
  0x1a   : > { %p2612_p3 = pneg %p2611_p0 }
  0x1c   : > { %p2617_p7 = pnand %p2615_p5, %p2612_p3 }
  0x1e   : > { %2620 = shalt.err (!%p2617_p7)
}
  0x1f   : > { %s2621_s11 = scalar_lea.vmem %s2880_s25, 1024  ;;  %p2629_p2 = scmp.lt.s32.totalorder %s2880_s25, %s2880_s25 }
  0x20   : > { %p2622_p9 = scmp.ne.s32.totalorder %s2880_s25, %s2621_s11  ;;  %p2630_p6 = scmp.lt.s32.totalorder %s2621_s11, %s2621_s11 }
  0x22   : > { %p2624_p10 = pnand %p2622_p9, %p2610_p13  ;;  %p2631_p4 = por %p2630_p6, %p2629_p2 }
  0x24   : > { %p2625_p1 = pneg %p2624_p10 }
  0x26   : > { %p2632_p8 = pnand %p2631_p4, %p2625_p1 }
  0x28   : > { %2635 = shalt.err (!%p2632_p8)
}
  0x29   : > { %s2799_s12 = smov 64   ;;  %s2800_s13 = smov 4  }
  0x2a   : > { %2542 = dma.hbm_to_vmem [thread:$0]  (!%p2887_p11), %s3546_s1, 1024, %s2880_s25, [#allocation6], %s2799_s12, %s2799_s12, %s2800_s13  }
  0x2b   : > { %p30_p2 = scmp.eq.s32.totalorder %s29_s29, 0  ;;  %p39_p1 = scmp.ne.s32.totalorder %s2792_s17, %s2788_s16 }
  0x2c   : > { %p40_p4 = scmp.eq.s32.totalorder %s2796_s18, 0  ;;  %p2558_p6 = scmp.lt.s32.totalorder %s2796_s18, 2 }
  0x2d   : > { %s2923_s30 = scalar_select %p30_p2, %s2792_s17, %s32_s28  }
  0x2e   : > { %p41_p8 = por %p40_p4, %p39_p1  ;;  %p3559_p10 = scmp.eq.s32.totalorder %s2855_s19, 1 }
  0x2f   : > { %s181_s6 = sand.u32 1, %s2792_s17   ;;  %s1955_s7 = smul.u32 12288, %s2796_s18 }
  0x30   : > { %p2927_p12 = por %p3559_p10, %p39_p1  ;;  %s2524_s8 = smul.u32 768, %s181_s6 }
  0x31   : > { %s2936_s10 = scalar_lea.hbm %s3545_s0, %s1955_s7  ;;  %p2938_p11 = pnand %p2558_p6, %p41_p8 }
  0x32   : > { %s185_s28 = scalar_lea.vmem [#allocation2], %s2524_s8  ;;  %s2944_s11 = scalar_lea.sflag [#allocation3], %s181_s6 }
  0x33   : > { %s192_s29 = sshll.u32 %s185_s28, 4  ;;  %s2636_s12 = scalar_lea.hbm %s2936_s10, 12288  ;;  %s2942_s29 = int_to_ptr.vmem [resolvable:$true] %s192_s29 }
  0x34   : > { %p2637_p13 = scmp.ne.s32.totalorder %s2936_s10, %s2636_s12  ;;  %p2638_p0 = pneg %p2938_p11 }
  0x35   : > { %s2641_s24 = scalar_lea.hbm %s3545_s0, 24576  ;;  %p2642_p7 = scmp.lt.u32.totalorder %s2936_s10, %s3545_s0 }
  0x36   : > { %p2639_p3 = pnand %p2638_p0, %p2637_p13  ;;  %p2643_p9 = scmp.lt.u32.totalorder %s2641_s24, %s2636_s12 }
  0x37   : > { %p2645_p1 = scmp.lt.u32.totalorder %s2636_s12, %s2936_s10 }
  0x38   : > { %p2640_p5 = pneg %p2639_p3  ;;  %p2644_p2 = por %p2643_p9, %p2642_p7 }
  0x3a   : > { %p2646_p4 = por %p2645_p1, %p2644_p2 }
  0x3c   : > { %p2647_p6 = pnand %p2646_p4, %p2640_p5 }
  0x3e   : > { %2650 = shalt.err (!%p2647_p6)
}
  0x3f   : > { %s2651_s6 = scalar_lea.vmem %s2942_s29, 12288  ;;  %s2801_s8 = smov [#allocation2]  }
  0x40   : > { %p2652_p8 = scmp.ne.s32.totalorder %s2942_s29, %s2651_s6  ;;  %s2656_s9 = sshll.u32 %s2801_s8, 4  ;;  %s2657_s9 = int_to_ptr.vmem [resolvable:$false] %s2656_s9 }
  0x41   : > { %s2658_s28 = scalar_lea.vmem %s2657_s9, 24576  ;;  %p2659_p3 = scmp.lt.s32.totalorder %s2942_s29, %s2657_s9 }
  0x42   : > { %p2654_p10 = pnand %p2652_p8, %p2638_p0  ;;  %p2660_p7 = scmp.lt.s32.totalorder %s2658_s28, %s2651_s6 }
  0x44   : > { %p2655_p13 = pneg %p2654_p10  ;;  %p2661_p9 = por %p2660_p7, %p2659_p3 }
  0x46   : > { %p2662_p2 = pnand %p2661_p9, %p2655_p13 }
  0x48   : > { %2665 = shalt.err (!%p2662_p2)
}
  0x49   : > { %s2802_s12 = smov 128   ;;  %s2803_s13 = smov 8  }
  0x4a   : > { %2546 = dma.hbm_to_vmem [thread:$0]  (!%p2938_p11), %s2936_s10, 12288, %s2942_s29, %s2944_s11, %s2802_s12, %s2802_s12, %s2803_s13  }
  0x4b   : > { %p3562_p0 = scmp.ne.s32.totalorder %s3557_s23, 0 }
  0x4d   : > { %204 = sbr.rel (%p3562_p0) target bundleno = 589 (0x24d), region = 28 }
  0x54   : > { %s2975_s14 = sand.u32 1, %s2788_s16   ;;  %p3563_p5 = scmp.ne.s32.totalorder %s3555_s21, 0 }
  0x55   : > { %s2525_s24 = smul.u32 768, %s2975_s14  ;;  %s207_s7 = scalar_lea.sflag [#allocation3], %s2975_s14 }
  0x57   : > { %s2979_s26 = scalar_lea.vmem [#allocation2], %s2525_s24 }
  0x58   : > { %2767 = dma.done.wait (%p3563_p5), %s207_s7, 12288  }
  0x59   : > { %2769 = vsyncadd (%p3563_p5), %s207_s7, 4294955008  ;;  %p3564_p11 = scmp.eq.s32.totalorder %s2855_s19, 0 }
  0x5b   : > { %2771 = dma.done.wait (%p3564_p11), [#allocation6], 1024   ;;  %p3565_p1 = pmov %p3564_p11 }
  0x5c   : > { %v2600_v0 = vld [vmem:[#allocation5] sm:$0xff]   ;;  %v2601_v1 = vld [vmem:[#allocation5 + $0x8] sm:$0xff]   ;;  %v2602_v2 = vld [vmem:[#allocation5 + $0x10] sm:$0xff]   ;;  %s2526_s21 = smul.u32 384, %s2975_s14  ;;  %s1656_s8 = scalar_lea.sflag [#allocation4], %s2975_s14 }
  0x5d   : > { %2773 = vsyncadd (%p3565_p1), [#allocation6], 4294966272  ;;  %2396 = vmatprep.subr.bf16.mxu0 %v2600_v0  ;;  %2508 = vmatprep.subr.bf16.mxu1 %v2600_v0  ;;  %v2603_v3 = vld [vmem:[#allocation5 + $0x18] sm:$0xff]   ;;  %v250_v4 = vld [vmem:[%s2979_s26] sm:$0xff]  ;;  %s2052_s10 = smul.u32 6144, %s2855_s19  ;;  %s2804_s28 = smov [#allocation7]  }
  0x5e   : > { %2397 = vmatpush3.bf16.msra.mxu0 %v2600_v0  ;;  %2516 = vmatpush3.bf16.msra.mxu1 %v2600_v0  ;;  %v251_v5 = vld [vmem:[%s2979_s26 + $0x8] sm:$0xff]  ;;  %v2604_v7 = vld [vmem:[#allocation5 + $0x20] sm:$0xff]   ;;  %v2606_v9 = vld [vmem:[#allocation5 + $0x30] sm:$0xff]   ;;  %s3096_s23 = scalar_lea.vmem [#allocation7], %s2526_s21  ;;  %s2670_s12 = sshll.u32 %s2804_s28, 4  ;;  %s2671_s12 = int_to_ptr.vmem [resolvable:$false] %s2670_s12 }
  0x5f   : > { %2398 = vmatprep.subr.bf16.mxu0 %v2601_v1  ;;  %2509 = vmatprep.subr.bf16.mxu1 %v2601_v1  ;;  %v346_v6 = vpack.c.bf16 %v251_v5, %v250_v4  ;;  %v2605_v8 = vld [vmem:[#allocation5 + $0x28] sm:$0xff]   ;;  %v2607_v10 = vld [vmem:[#allocation5 + $0x38] sm:$0xff]   ;;  %v298_v11 = vld [vmem:[%s2979_s26 + $0x180] sm:$0xff]  ;;  %s1677_s25 = sshll.u32 %s3096_s23, 4  ;;  %s3284_s6 = scalar_lea.hbm %s3547_s2, %s2052_s10  ;;  %s3274_s25 = int_to_ptr.vmem [resolvable:$true] %s1677_s25 }
  0x60   : > { %v299_v12 = vld [vmem:[%s2979_s26 + $0x188] sm:$0xff]  ;;  %v252_v14 = vld [vmem:[%s2979_s26 + $0x10] sm:$0xff]  ;;  %v253_v15 = vld [vmem:[%s2979_s26 + $0x18] sm:$0xff]  ;;  %s2666_s9 = scalar_lea.vmem %s3274_s25, 6144  ;;  %s2672_s13 = scalar_lea.vmem %s2671_s12, 12288 }
  0x61   : > { %2412 = vmatprep.mubr.bf16.mxu0 %v346_v6  ;;  %v370_v13 = vpack.c.bf16 %v299_v12, %v298_v11  ;;  %v254_v16 = vld [vmem:[%s2979_s26 + $0x20] sm:$0xff]  ;;  %v255_v17 = vld [vmem:[%s2979_s26 + $0x28] sm:$0xff]  ;;  %v300_v18 = vld [vmem:[%s2979_s26 + $0x190] sm:$0xff]  ;;  %v347_v22 = vpack.c.bf16 %v253_v15, %v252_v14  ;;  %p2667_p4 = scmp.ne.s32.totalorder %s3274_s25, %s2666_s9  ;;  %p2673_p10 = scmp.lt.s32.totalorder %s3274_s25, %s2671_s12 }
  0x62   : > { %2399 = vmatpush3.bf16.msra.mxu0 %v2601_v1  ;;  %2517 = vmatpush3.bf16.msra.mxu1 %v2601_v1  ;;  %v301_v19 = vld [vmem:[%s2979_s26 + $0x198] sm:$0xff]  ;;  %v302_v20 = vld [vmem:[%s2979_s26 + $0x1a0] sm:$0xff]  ;;  %v303_v21 = vld [vmem:[%s2979_s26 + $0x1a8] sm:$0xff]  ;;  %v348_v23 = vpack.c.bf16 %v255_v17, %v254_v16  ;;  %p2674_p13 = scmp.lt.s32.totalorder %s2672_s13, %s2666_s9 }
  0x63   : > { %2400 = vmatprep.subr.bf16.mxu0 %v2602_v2  ;;  %2510 = vmatprep.subr.bf16.mxu1 %v2602_v2  ;;  %v371_v24 = vpack.c.bf16 %v301_v19, %v300_v18  ;;  %v372_v25 = vpack.c.bf16 %v303_v21, %v302_v20  ;;  %v256_v26 = vld [vmem:[%s2979_s26 + $0x30] sm:$0xff]  ;;  %v257_v27 = vld [vmem:[%s2979_s26 + $0x38] sm:$0xff]  ;;  %v258_v28 = vld [vmem:[%s2979_s26 + $0x40] sm:$0xff]  ;;  %p2668_p6 = pnand %p2667_p4, %p2927_p12 }
  0x64   : > { %2460 = vmatprep.mubr.bf16.mxu1 %v370_v13  ;;  %v259_v29 = vld [vmem:[%s2979_s26 + $0x48] sm:$0xff]  ;;  %v304_v30 = vld [vmem:[%s2979_s26 + $0x1b0] sm:$0xff]  ;;  %v305_v31 = vld [vmem:[%s2979_s26 + $0x1b8] sm:$0xff]  ;;  %v349_v34 = vpack.c.bf16 %v257_v27, %v256_v26  ;;  %p2675_p3 = por %p2674_p13, %p2673_p10 }
  0x65   : > { %v306_v32 = vld [vmem:[%s2979_s26 + $0x1c0] sm:$0xff]  ;;  %v307_v33 = vld [vmem:[%s2979_s26 + $0x1c8] sm:$0xff]  ;;  %v350_v35 = vpack.c.bf16 %v259_v29, %v258_v28  ;;  %v373_v36 = vpack.c.bf16 %v305_v31, %v304_v30  ;;  %v260_v38 = vld [vmem:[%s2979_s26 + $0x50] sm:$0xff]  ;;  %p2669_p8 = pneg %p2668_p6 }
  0x66   : > { %2401 = vmatpush3.bf16.msra.mxu0 %v2602_v2  ;;  %2518 = vmatpush3.bf16.msra.mxu1 %v2602_v2  ;;  %v374_v37 = vpack.c.bf16 %v307_v33, %v306_v32  ;;  %v261_v39 = vld [vmem:[%s2979_s26 + $0x58] sm:$0xff]  ;;  %v262_v40 = vld [vmem:[%s2979_s26 + $0x60] sm:$0xff]  ;;  %v263_v41 = vld [vmem:[%s2979_s26 + $0x68] sm:$0xff] }
  0x67   : > { %2402 = vmatprep.subr.bf16.mxu0 %v2603_v3  ;;  %2511 = vmatprep.subr.bf16.mxu1 %v2603_v3  ;;  %v308_v42 = vld [vmem:[%s2979_s26 + $0x1d0] sm:$0xff]  ;;  %v309_v43 = vld [vmem:[%s2979_s26 + $0x1d8] sm:$0xff]  ;;  %v310_v44 = vld [vmem:[%s2979_s26 + $0x1e0] sm:$0xff]  ;;  %v351_v46 = vpack.c.bf16 %v261_v39, %v260_v38  ;;  %v352_v47 = vpack.c.bf16 %v263_v41, %v262_v40  ;;  %p2676_p7 = pnand %p2675_p3, %p2669_p8 }
  0x68   : > { %v311_v45 = vld [vmem:[%s2979_s26 + $0x1e8] sm:$0xff]  ;;  %v375_v48 = vpack.c.bf16 %v309_v43, %v308_v42  ;;  %v264_v50 = vld [vmem:[%s2979_s26 + $0x70] sm:$0xff]  ;;  %v265_v51 = vld [vmem:[%s2979_s26 + $0x78] sm:$0xff] }
  0x69   : > { %v376_v49 = vpack.c.bf16 %v311_v45, %v310_v44  ;;  %v266_v52 = vld [vmem:[%s2979_s26 + $0x80] sm:$0xff]  ;;  %v267_v53 = vld [vmem:[%s2979_s26 + $0x88] sm:$0xff]  ;;  %v312_v54 = vld [vmem:[%s2979_s26 + $0x1f0] sm:$0xff]  ;;  %v353_v58 = vpack.c.bf16 %v265_v51, %v264_v50 }
  0x6a   : > { %2403 = vmatpush3.bf16.msra.mxu0 %v2603_v3  ;;  %2519 = vmatpush3.bf16.msra.mxu1 %v2603_v3  ;;  %v313_v55 = vld [vmem:[%s2979_s26 + $0x1f8] sm:$0xff]  ;;  %v314_v56 = vld [vmem:[%s2979_s26 + $0x200] sm:$0xff]  ;;  %v315_v57 = vld [vmem:[%s2979_s26 + $0x208] sm:$0xff]  ;;  %v354_v59 = vpack.c.bf16 %v267_v53, %v266_v52 }
  0x6b   : > { %2404 = vmatprep.subr.bf16.mxu0 %v2604_v7  ;;  %2512 = vmatprep.subr.bf16.mxu1 %v2604_v7  ;;  %v377_v60 = vpack.c.bf16 %v313_v55, %v312_v54  ;;  %v378_v61 = vpack.c.bf16 %v315_v57, %v314_v56  ;;  %v268_v62 = vld [vmem:[%s2979_s26 + $0x90] sm:$0xff]  ;;  %v269_v63 = vld [vmem:[%s2979_s26 + $0x98] sm:$0xff]  ;;  %v270_v0 = vld [vmem:[%s2979_s26 + $0xa0] sm:$0xff] }
  0x6c   : > { %v271_v1 = vld [vmem:[%s2979_s26 + $0xa8] sm:$0xff]  ;;  %v316_v2 = vld [vmem:[%s2979_s26 + $0x210] sm:$0xff]  ;;  %v317_v3 = vld [vmem:[%s2979_s26 + $0x218] sm:$0xff]  ;;  %v355_v6 = vpack.c.bf16 %v269_v63, %v268_v62 }
  0x6d   : > { %v318_v4 = vld [vmem:[%s2979_s26 + $0x220] sm:$0xff]  ;;  %v319_v5 = vld [vmem:[%s2979_s26 + $0x228] sm:$0xff]  ;;  %v273_v11 = vld [vmem:[%s2979_s26 + $0xb8] sm:$0xff] }
  0x6e   : > { %2405 = vmatpush3.bf16.msra.mxu0 %v2604_v7  ;;  %2520 = vmatpush3.bf16.msra.mxu1 %v2604_v7  ;;  %v356_v7 = vpack.c.bf16 %v271_v1, %v270_v0  ;;  %v274_v12 = vld [vmem:[%s2979_s26 + $0xc0] sm:$0xff]  ;;  %v275_v13 = vld [vmem:[%s2979_s26 + $0xc8] sm:$0xff]  ;;  %v320_v14 = vld [vmem:[%s2979_s26 + $0x230] sm:$0xff] }
  0x6f   : > { %2406 = vmatprep.subr.bf16.mxu0 %v2605_v8  ;;  %2513 = vmatprep.subr.bf16.mxu1 %v2605_v8  ;;  %v321_v15 = vld [vmem:[%s2979_s26 + $0x238] sm:$0xff]  ;;  %v322_v16 = vld [vmem:[%s2979_s26 + $0x240] sm:$0xff]  ;;  %v323_v17 = vld [vmem:[%s2979_s26 + $0x248] sm:$0xff]  ;;  %v358_v19 = vpack.c.bf16 %v275_v13, %v274_v12 }
  0x70   : > { %v381_v20 = vpack.c.bf16 %v321_v15, %v320_v14  ;;  %v382_v21 = vpack.c.bf16 %v323_v17, %v322_v16  ;;  %v324_v26 = vld [vmem:[%s2979_s26 + $0x250] sm:$0xff]  ;;  %v325_v27 = vld [vmem:[%s2979_s26 + $0x258] sm:$0xff]  ;;  %v326_v28 = vld [vmem:[%s2979_s26 + $0x260] sm:$0xff] }
  0x71   : > { %v327_v29 = vld [vmem:[%s2979_s26 + $0x268] sm:$0xff]  ;;  %v383_v32 = vpack.c.bf16 %v325_v27, %v324_v26  ;;  %v328_v38 = vld [vmem:[%s2979_s26 + $0x270] sm:$0xff]  ;;  %v329_v39 = vld [vmem:[%s2979_s26 + $0x278] sm:$0xff] }
  0x72   : > { %2407 = vmatpush3.bf16.msra.mxu0 %v2605_v8  ;;  %2521 = vmatpush3.bf16.msra.mxu1 %v2605_v8  ;;  %v379_v8 = vpack.c.bf16 %v317_v3, %v316_v2  ;;  %v384_v33 = vpack.c.bf16 %v327_v29, %v326_v28  ;;  %v330_v40 = vld [vmem:[%s2979_s26 + $0x280] sm:$0xff]  ;;  %v331_v41 = vld [vmem:[%s2979_s26 + $0x288] sm:$0xff]  ;;  %v385_v44 = vpack.c.bf16 %v329_v39, %v328_v38  ;;  %v332_v50 = vld [vmem:[%s2979_s26 + $0x290] sm:$0xff] }
  0x73   : > { %2408 = vmatprep.subr.bf16.mxu0 %v2606_v9  ;;  %2514 = vmatprep.subr.bf16.mxu1 %v2606_v9  ;;  %v386_v45 = vpack.c.bf16 %v331_v41, %v330_v40  ;;  %v333_v51 = vld [vmem:[%s2979_s26 + $0x298] sm:$0xff]  ;;  %v334_v52 = vld [vmem:[%s2979_s26 + $0x2a0] sm:$0xff]  ;;  %v335_v53 = vld [vmem:[%s2979_s26 + $0x2a8] sm:$0xff] }
  0x74   : > { %v387_v56 = vpack.c.bf16 %v333_v51, %v332_v50  ;;  %v388_v57 = vpack.c.bf16 %v335_v53, %v334_v52  ;;  %v336_v62 = vld [vmem:[%s2979_s26 + $0x2b0] sm:$0xff]  ;;  %v337_v63 = vld [vmem:[%s2979_s26 + $0x2b8] sm:$0xff]  ;;  %v338_v0 = vld [vmem:[%s2979_s26 + $0x2c0] sm:$0xff] }
  0x75   : > { %v339_v1 = vld [vmem:[%s2979_s26 + $0x2c8] sm:$0xff]  ;;  %v342_v12 = vld [vmem:[%s2979_s26 + $0x2e0] sm:$0xff] }
  0x76   : > { %2409 = vmatpush3.bf16.msra.mxu0 %v2606_v9  ;;  %2522 = vmatpush3.bf16.msra.mxu1 %v2606_v9  ;;  %v380_v9 = vpack.c.bf16 %v319_v5, %v318_v4  ;;  %v389_v4 = vpack.c.bf16 %v337_v63, %v336_v62  ;;  %v390_v5 = vpack.c.bf16 %v339_v1, %v338_v0  ;;  %v343_v13 = vld [vmem:[%s2979_s26 + $0x2e8] sm:$0xff] }
  0x77   : > { %2410 = vmatprep.subr.bf16.mxu0 %v2607_v10  ;;  %2515 = vmatprep.subr.bf16.mxu1 %v2607_v10  ;;  %v392_v17 = vpack.c.bf16 %v343_v13, %v342_v12 }
  0x7a   : > { %2411 = vmatpush3.bf16.msra.mxu0 %v2607_v10  ;;  %2523 = vmatpush3.bf16.msra.mxu1 %v2607_v10  ;;  %v272_v10 = vld [vmem:[%s2979_s26 + $0xb0] sm:$0xff] }
  0x7b   : > { %v357_v18 = vpack.c.bf16 %v273_v11, %v272_v10  ;;  %v340_v10 = vld [vmem:[%s2979_s26 + $0x2d0] sm:$0xff]  ;;  %v341_v11 = vld [vmem:[%s2979_s26 + $0x2d8] sm:$0xff] }
  0x7c   : > { %v391_v16 = vpack.c.bf16 %v341_v11, %v340_v10 }
  0x7d   : > { %2413 = vmatmul.mubr.bf16.vlgmr.msra.gmra.mrb[0].mxu0 %v347_v22  ;;  %2461 = vmatmul.mubr.bf16.vlgmr.msra.gmra.mrb[0].mxu1 %v371_v24  ;;  %v276_v22 = vld [vmem:[%s2979_s26 + $0xd0] sm:$0xff]  ;;  %v278_v24 = vld [vmem:[%s2979_s26 + $0xe0] sm:$0xff] }
  0x7e   : > { %2416 = vmatprep.mubr.bf16.mxu0 %v348_v23  ;;  %2464 = vmatprep.mubr.bf16.mxu1 %v372_v25  ;;  %v277_v23 = vld [vmem:[%s2979_s26 + $0xd8] sm:$0xff]  ;;  %v279_v25 = vld [vmem:[%s2979_s26 + $0xe8] sm:$0xff] }
  0x7f   : > { %v359_v30 = vpack.c.bf16 %v277_v23, %v276_v22  ;;  %v360_v31 = vpack.c.bf16 %v279_v25, %v278_v24 }
  0x85   : > { %2417 = vmatmul.mubr.bf16.gmra.mrb[4].mxu0 %v349_v34  ;;  %2465 = vmatmul.mubr.bf16.gmra.mrb[4].mxu1 %v373_v36  ;;  %v280_v34 = vld [vmem:[%s2979_s26 + $0xf0] sm:$0xff]  ;;  %v282_v36 = vld [vmem:[%s2979_s26 + $0x100] sm:$0xff] }
  0x86   : > { %2420 = vmatprep.mubr.bf16.mxu0 %v350_v35  ;;  %2468 = vmatprep.mubr.bf16.mxu1 %v374_v37  ;;  %v281_v35 = vld [vmem:[%s2979_s26 + $0xf8] sm:$0xff]  ;;  %v283_v37 = vld [vmem:[%s2979_s26 + $0x108] sm:$0xff] }
  0x87   : > { %v361_v42 = vpack.c.bf16 %v281_v35, %v280_v34  ;;  %v362_v43 = vpack.c.bf16 %v283_v37, %v282_v36 }
  0x8d   : > { %2421 = vmatmul.mubr.bf16.gmra.mrb[8].mxu0 %v351_v46  ;;  %2469 = vmatmul.mubr.bf16.gmra.mrb[8].mxu1 %v375_v48  ;;  %v284_v46 = vld [vmem:[%s2979_s26 + $0x110] sm:$0xff]  ;;  %v286_v48 = vld [vmem:[%s2979_s26 + $0x120] sm:$0xff] }
  0x8e   : > { %2424 = vmatprep.mubr.bf16.mxu0 %v352_v47  ;;  %2472 = vmatprep.mubr.bf16.mxu1 %v376_v49  ;;  %v285_v47 = vld [vmem:[%s2979_s26 + $0x118] sm:$0xff]  ;;  %v287_v49 = vld [vmem:[%s2979_s26 + $0x128] sm:$0xff] }
  0x8f   : > { %v363_v54 = vpack.c.bf16 %v285_v47, %v284_v46  ;;  %v364_v55 = vpack.c.bf16 %v287_v49, %v286_v48 }
  0x95   : > { %2425 = vmatmul.mubr.bf16.gmra.mrb[12].mxu0 %v353_v58  ;;  %2473 = vmatmul.mubr.bf16.gmra.mrb[12].mxu1 %v377_v60  ;;  %v288_v58 = vld [vmem:[%s2979_s26 + $0x130] sm:$0xff]  ;;  %v290_v60 = vld [vmem:[%s2979_s26 + $0x140] sm:$0xff] }
  0x96   : > { %2428 = vmatprep.mubr.bf16.mxu0 %v354_v59  ;;  %2476 = vmatprep.mubr.bf16.mxu1 %v378_v61  ;;  %v289_v59 = vld [vmem:[%s2979_s26 + $0x138] sm:$0xff]  ;;  %v291_v61 = vld [vmem:[%s2979_s26 + $0x148] sm:$0xff] }
  0x97   : > { %v365_v2 = vpack.c.bf16 %v289_v59, %v288_v58  ;;  %v366_v3 = vpack.c.bf16 %v291_v61, %v290_v60 }
  0x9d   : > { %2429 = vmatmul.mubr.bf16.gmra.mrb[16].mxu0 %v355_v6  ;;  %2477 = vmatmul.mubr.bf16.gmra.mrb[16].mxu1 %v379_v8  ;;  %v292_v6 = vld [vmem:[%s2979_s26 + $0x150] sm:$0xff]  ;;  %v294_v8 = vld [vmem:[%s2979_s26 + $0x160] sm:$0xff] }
  0x9e   : > { %2432 = vmatprep.mubr.bf16.mxu0 %v356_v7  ;;  %2480 = vmatprep.mubr.bf16.mxu1 %v380_v9  ;;  %v293_v7 = vld [vmem:[%s2979_s26 + $0x158] sm:$0xff]  ;;  %v295_v9 = vld [vmem:[%s2979_s26 + $0x168] sm:$0xff] }
  0x9f   : > { %v367_v14 = vpack.c.bf16 %v293_v7, %v292_v6  ;;  %v368_v15 = vpack.c.bf16 %v295_v9, %v294_v8 }
  0xa5   : > { %2433 = vmatmul.mubr.bf16.gmra.mrb[20].mxu0 %v357_v18  ;;  %2481 = vmatmul.mubr.bf16.gmra.mrb[20].mxu1 %v381_v20  ;;  %v296_v18 = vld [vmem:[%s2979_s26 + $0x170] sm:$0xff] }
  0xa6   : > { %2436 = vmatprep.mubr.bf16.mxu0 %v358_v19  ;;  %2484 = vmatprep.mubr.bf16.mxu1 %v382_v21  ;;  %v297_v19 = vld [vmem:[%s2979_s26 + $0x178] sm:$0xff]  ;;  %v344_v20 = vld [vmem:[%s2979_s26 + $0x2f0] sm:$0xff] }
  0xa7   : > { %v345_v21 = vld [vmem:[%s2979_s26 + $0x2f8] sm:$0xff]  ;;  %v369_v22 = vpack.c.bf16 %v297_v19, %v296_v18 }
  0xa8   : > { %v393_v23 = vpack.c.bf16 %v345_v21, %v344_v20 }
  0xad   : > { %2437 = vmatmul.mubr.bf16.gmra.mrb[24].mxu0 %v359_v30  ;;  %2485 = vmatmul.mubr.bf16.gmra.mrb[24].mxu1 %v383_v32 }
  0xae   : > { %2440 = vmatprep.mubr.bf16.mxu0 %v360_v31  ;;  %2488 = vmatprep.mubr.bf16.mxu1 %v384_v33 }
  0xb5   : > { %2441 = vmatmul.mubr.bf16.gmra.mrb[28].mxu0 %v361_v42  ;;  %2489 = vmatmul.mubr.bf16.gmra.mrb[28].mxu1 %v385_v44 }
  0xb6   : > { %2444 = vmatprep.mubr.bf16.mxu0 %v362_v43  ;;  %2492 = vmatprep.mubr.bf16.mxu1 %v386_v45 }
  0xbd   : > { %2445 = vmatmul.mubr.bf16.gmra.mrb[32].mxu0 %v363_v54  ;;  %2493 = vmatmul.mubr.bf16.gmra.mrb[32].mxu1 %v387_v56 }
  0xbe   : > { %2448 = vmatprep.mubr.bf16.mxu0 %v364_v55  ;;  %2496 = vmatprep.mubr.bf16.mxu1 %v388_v57 }
  0xc5   : > { %2449 = vmatmul.mubr.bf16.gmra.mrb[36].mxu0 %v365_v2  ;;  %2497 = vmatmul.mubr.bf16.gmra.mrb[36].mxu1 %v389_v4 }
  0xc6   : > { %2452 = vmatprep.mubr.bf16.mxu0 %v366_v3  ;;  %2500 = vmatprep.mubr.bf16.mxu1 %v390_v5 }
  0xcd   : > { %2453 = vmatmul.mubr.bf16.gmra.mrb[40].mxu0 %v367_v14  ;;  %2501 = vmatmul.mubr.bf16.gmra.mrb[40].mxu1 %v391_v16 }
  0xce   : > { %2456 = vmatprep.mubr.bf16.mxu0 %v368_v15  ;;  %2504 = vmatprep.mubr.bf16.mxu1 %v392_v17 }
  0xd5   : > { %2457 = vmatmul.mubr.bf16.gmra.mrb[44].mxu0 %v369_v22  ;;  %2505 = vmatmul.mubr.bf16.gmra.mrb[44].mxu1 %v393_v23 }
 0x150   : > { %v2414_v24 = vpop.f32.mrb[0].mxu0  ;;  %v3086_v26 = vpop.f32.mrb[0].mxu1 }
 0x151   : > { %v492_v25 = vpop.f32.mrb[1].mxu0  ;;  %v3088_v28 = vpop.f32.mrb[1].mxu1  ;;  %v1459_v39 = vmul.f32 %v2414_v24, %v2414_v24 }
 0x152   : > { %v2415_v27 = vpop.f32.mrb[2].mxu0  ;;  %v1457_v29 = vmul.f32 %v492_v25, %v492_v25  ;;  %v3090_v32 = vpop.f32.mrb[2].mxu1 }
 0x153   : > { %v2061_v30 = vpack.c.bf16 %v2415_v27, %v2414_v24  ;;  %v495_v31 = vpop.f32.mrb[3].mxu0  ;;  %v2181_v36 = vpack.c.bf16 %v3090_v32, %v3086_v26  ;;  %v3094_v37 = vpop.f32.mrb[3].mxu1  ;;  %v1460_v42 = vmul.f32 %v2415_v27, %v2415_v27 }
 0x154   : > { %v2056_v33 = vpack.c.bf16 %v495_v31, %v492_v25  ;;  %v1355_v34 = vadd.f32 %v495_v31, %v492_v25  ;;  %v1458_v35 = vmul.f32 %v495_v31, %v495_v31  ;;  %v2176_v38 = vpack.c.bf16 %v3094_v37, %v3088_v28 }
 0x155   : > { %2293 = vst [vmem:[%s3096_s23 + $0x8] sm:$0xff] %v2061_v30   ;;  %2317 = vst [vmem:[%s3096_s23 + $0xc8] sm:$0xff] %v2181_v36  }
 0x156   : > { %2057 = vst [vmem:[%s3096_s23] sm:$0xff] %v2056_v33   ;;  %v1356_v40 = vadd.f32 %v2414_v24, %v1355_v34  ;;  %v1553_v41 = vadd.f32 %v1458_v35, %v1457_v29  ;;  %2316 = vst [vmem:[%s3096_s23 + $0xc0] sm:$0xff] %v2176_v38  }
 0x158   : > { %v1554_v43 = vadd.f32 %v1553_v41, %v1459_v39  ;;  %v2418_v44 = vpop.f32.mrb[4].mxu0  ;;  %v1357_v45 = vadd.f32 %v2415_v27, %v1356_v40  ;;  %v3104_v47 = vpop.f32.mrb[4].mxu1 }
 0x159   : > { %v508_v46 = vpop.f32.mrb[5].mxu0  ;;  %v3106_v52 = vpop.f32.mrb[5].mxu1  ;;  %v1463_v63 = vmul.f32 %v2418_v44, %v2418_v44 }
 0x15a   : > { %v1358_v48 = vadd.f32 %v1357_v45, %v508_v46  ;;  %v1461_v49 = vmul.f32 %v508_v46, %v508_v46  ;;  %v1555_v50 = vadd.f32 %v1554_v43, %v1460_v42  ;;  %v2419_v51 = vpop.f32.mrb[6].mxu0  ;;  %v3108_v55 = vpop.f32.mrb[6].mxu1 }
 0x15b   : > { %v2071_v53 = vpack.c.bf16 %v2419_v51, %v2418_v44  ;;  %v511_v54 = vpop.f32.mrb[7].mxu0  ;;  %v3110_v60 = vpop.f32.mrb[7].mxu1  ;;  %v2191_v61 = vpack.c.bf16 %v3108_v55, %v3104_v47  ;;  %v1464_v2 = vmul.f32 %v2419_v51, %v2419_v51 }
 0x15c   : > { %v1556_v56 = vadd.f32 %v1555_v50, %v1461_v49  ;;  %v2066_v57 = vpack.c.bf16 %v511_v54, %v508_v46  ;;  %v1359_v58 = vadd.f32 %v1358_v48, %v511_v54  ;;  %v1462_v59 = vmul.f32 %v511_v54, %v511_v54 }
 0x15d   : > { %2295 = vst [vmem:[%s3096_s23 + $0x18] sm:$0xff] %v2071_v53   ;;  %v2186_v62 = vpack.c.bf16 %v3110_v60, %v3106_v52  ;;  %2319 = vst [vmem:[%s3096_s23 + $0xd8] sm:$0xff] %v2191_v61  }
 0x15e   : > { %2294 = vst [vmem:[%s3096_s23 + $0x10] sm:$0xff] %v2066_v57   ;;  %v1360_v0 = vadd.f32 %v2418_v44, %v1359_v58  ;;  %v1557_v1 = vadd.f32 %v1556_v56, %v1462_v59 }
 0x15f   : > { %2318 = vst [vmem:[%s3096_s23 + $0xd0] sm:$0xff] %v2186_v62  }
 0x160   : > { %v1558_v3 = vadd.f32 %v1557_v1, %v1463_v63  ;;  %v2422_v4 = vpop.f32.mrb[8].mxu0  ;;  %v1361_v5 = vadd.f32 %v2419_v51, %v1360_v0  ;;  %v3120_v7 = vpop.f32.mrb[8].mxu1 }
 0x161   : > { %v524_v6 = vpop.f32.mrb[9].mxu0  ;;  %v3122_v12 = vpop.f32.mrb[9].mxu1  ;;  %v1467_v23 = vmul.f32 %v2422_v4, %v2422_v4 }
 0x162   : > { %v1362_v8 = vadd.f32 %v1361_v5, %v524_v6  ;;  %v1465_v9 = vmul.f32 %v524_v6, %v524_v6  ;;  %v1559_v10 = vadd.f32 %v1558_v3, %v1464_v2  ;;  %v2423_v11 = vpop.f32.mrb[10].mxu0  ;;  %v3124_v15 = vpop.f32.mrb[10].mxu1 }
 0x163   : > { %v2081_v13 = vpack.c.bf16 %v2423_v11, %v2422_v4  ;;  %v527_v14 = vpop.f32.mrb[11].mxu0  ;;  %v3126_v20 = vpop.f32.mrb[11].mxu1  ;;  %v2201_v21 = vpack.c.bf16 %v3124_v15, %v3120_v7  ;;  %v1468_v27 = vmul.f32 %v2423_v11, %v2423_v11 }
 0x164   : > { %v1560_v16 = vadd.f32 %v1559_v10, %v1465_v9  ;;  %v2076_v17 = vpack.c.bf16 %v527_v14, %v524_v6  ;;  %v1363_v18 = vadd.f32 %v1362_v8, %v527_v14  ;;  %v1466_v19 = vmul.f32 %v527_v14, %v527_v14 }
 0x165   : > { %2297 = vst [vmem:[%s3096_s23 + $0x28] sm:$0xff] %v2081_v13   ;;  %v2196_v22 = vpack.c.bf16 %v3126_v20, %v3122_v12  ;;  %2321 = vst [vmem:[%s3096_s23 + $0xe8] sm:$0xff] %v2201_v21  }
 0x166   : > { %2296 = vst [vmem:[%s3096_s23 + $0x20] sm:$0xff] %v2076_v17   ;;  %v1364_v24 = vadd.f32 %v2422_v4, %v1363_v18  ;;  %v1561_v25 = vadd.f32 %v1560_v16, %v1466_v19 }
 0x167   : > { %2320 = vst [vmem:[%s3096_s23 + $0xe0] sm:$0xff] %v2196_v22  }
 0x168   : > { %v1562_v29 = vadd.f32 %v1561_v25, %v1467_v23  ;;  %v2426_v30 = vpop.f32.mrb[12].mxu0  ;;  %v1365_v31 = vadd.f32 %v2423_v11, %v1364_v24  ;;  %v3136_v34 = vpop.f32.mrb[12].mxu1 }
 0x169   : > { %v540_v33 = vpop.f32.mrb[13].mxu0  ;;  %v3138_v40 = vpop.f32.mrb[13].mxu1  ;;  %v1471_v53 = vmul.f32 %v2426_v30, %v2426_v30 }
 0x16a   : > { %v1366_v35 = vadd.f32 %v1365_v31, %v540_v33  ;;  %v1469_v36 = vmul.f32 %v540_v33, %v540_v33  ;;  %v1563_v38 = vadd.f32 %v1562_v29, %v1468_v27  ;;  %v2427_v39 = vpop.f32.mrb[14].mxu0  ;;  %v3140_v43 = vpop.f32.mrb[14].mxu1 }
 0x16b   : > { %v2091_v41 = vpack.c.bf16 %v2427_v39, %v2426_v30  ;;  %v543_v42 = vpop.f32.mrb[15].mxu0  ;;  %v3142_v49 = vpop.f32.mrb[15].mxu1  ;;  %v2211_v50 = vpack.c.bf16 %v3140_v43, %v3136_v34  ;;  %v1472_v57 = vmul.f32 %v2427_v39, %v2427_v39 }
 0x16c   : > { %v1564_v44 = vadd.f32 %v1563_v38, %v1469_v36  ;;  %v2086_v45 = vpack.c.bf16 %v543_v42, %v540_v33  ;;  %v1367_v46 = vadd.f32 %v1366_v35, %v543_v42  ;;  %v1470_v48 = vmul.f32 %v543_v42, %v543_v42 }
 0x16d   : > { %2299 = vst [vmem:[%s3096_s23 + $0x38] sm:$0xff] %v2091_v41   ;;  %v2206_v51 = vpack.c.bf16 %v3142_v49, %v3138_v40  ;;  %2323 = vst [vmem:[%s3096_s23 + $0xf8] sm:$0xff] %v2211_v50  }
 0x16e   : > { %2298 = vst [vmem:[%s3096_s23 + $0x30] sm:$0xff] %v2086_v45   ;;  %v1368_v54 = vadd.f32 %v2426_v30, %v1367_v46  ;;  %v1565_v56 = vadd.f32 %v1564_v44, %v1470_v48 }
 0x16f   : > { %2322 = vst [vmem:[%s3096_s23 + $0xf0] sm:$0xff] %v2206_v51  }
 0x170   : > { %v1566_v58 = vadd.f32 %v1565_v56, %v1471_v53  ;;  %v2430_v59 = vpop.f32.mrb[16].mxu0  ;;  %v1369_v61 = vadd.f32 %v2427_v39, %v1368_v54  ;;  %v3152_v63 = vpop.f32.mrb[16].mxu1 }
 0x171   : > { %v556_v62 = vpop.f32.mrb[17].mxu0  ;;  %v3154_v4 = vpop.f32.mrb[17].mxu1  ;;  %v1475_v18 = vmul.f32 %v2430_v59, %v2430_v59 }
 0x172   : > { %v1370_v0 = vadd.f32 %v1369_v61, %v556_v62  ;;  %v1473_v1 = vmul.f32 %v556_v62, %v556_v62  ;;  %v1567_v2 = vadd.f32 %v1566_v58, %v1472_v57  ;;  %v2431_v3 = vpop.f32.mrb[18].mxu0  ;;  %v3156_v8 = vpop.f32.mrb[18].mxu1 }
 0x173   : > { %v2101_v5 = vpack.c.bf16 %v2431_v3, %v2430_v59  ;;  %v559_v6 = vpop.f32.mrb[19].mxu0  ;;  %v3158_v14 = vpop.f32.mrb[19].mxu1  ;;  %v2221_v16 = vpack.c.bf16 %v3156_v8, %v3152_v63  ;;  %v1476_v22 = vmul.f32 %v2431_v3, %v2431_v3 }
 0x174   : > { %v1568_v9 = vadd.f32 %v1567_v2, %v1473_v1  ;;  %v2096_v10 = vpack.c.bf16 %v559_v6, %v556_v62  ;;  %v1371_v11 = vadd.f32 %v1370_v0, %v559_v6  ;;  %v1474_v13 = vmul.f32 %v559_v6, %v559_v6 }
 0x175   : > { %2301 = vst [vmem:[%s3096_s23 + $0x48] sm:$0xff] %v2101_v5   ;;  %v2216_v17 = vpack.c.bf16 %v3158_v14, %v3154_v4  ;;  %2325 = vst [vmem:[%s3096_s23 + $0x108] sm:$0xff] %v2221_v16  }
 0x176   : > { %2300 = vst [vmem:[%s3096_s23 + $0x40] sm:$0xff] %v2096_v10   ;;  %v1372_v19 = vadd.f32 %v2430_v59, %v1371_v11  ;;  %v1569_v21 = vadd.f32 %v1568_v9, %v1474_v13 }
 0x177   : > { %2324 = vst [vmem:[%s3096_s23 + $0x100] sm:$0xff] %v2216_v17  }
 0x178   : > { %v1570_v23 = vadd.f32 %v1569_v21, %v1475_v18  ;;  %v2434_v24 = vpop.f32.mrb[20].mxu0  ;;  %v1373_v25 = vadd.f32 %v2431_v3, %v1372_v19  ;;  %v3168_v29 = vpop.f32.mrb[20].mxu1 }
 0x179   : > { %v572_v27 = vpop.f32.mrb[21].mxu0  ;;  %v3170_v36 = vpop.f32.mrb[21].mxu1  ;;  %v1479_v53 = vmul.f32 %v2434_v24, %v2434_v24 }
 0x17a   : > { %v1374_v30 = vadd.f32 %v1373_v25, %v572_v27  ;;  %v1477_v31 = vmul.f32 %v572_v27, %v572_v27  ;;  %v1571_v33 = vadd.f32 %v1570_v23, %v1476_v22  ;;  %v2435_v35 = vpop.f32.mrb[22].mxu0  ;;  %v3172_v41 = vpop.f32.mrb[22].mxu1 }
 0x17b   : > { %v2111_v38 = vpack.c.bf16 %v2435_v35, %v2434_v24  ;;  %v575_v39 = vpop.f32.mrb[23].mxu0  ;;  %v3174_v48 = vpop.f32.mrb[23].mxu1  ;;  %v2231_v50 = vpack.c.bf16 %v3172_v41, %v3168_v29  ;;  %v1480_v57 = vmul.f32 %v2435_v35, %v2435_v35 }
 0x17c   : > { %v1572_v42 = vadd.f32 %v1571_v33, %v1477_v31  ;;  %v2106_v44 = vpack.c.bf16 %v575_v39, %v572_v27  ;;  %v1375_v45 = vadd.f32 %v1374_v30, %v575_v39  ;;  %v1478_v46 = vmul.f32 %v575_v39, %v575_v39 }
 0x17d   : > { %2303 = vst [vmem:[%s3096_s23 + $0x58] sm:$0xff] %v2111_v38   ;;  %v2226_v51 = vpack.c.bf16 %v3174_v48, %v3170_v36  ;;  %2327 = vst [vmem:[%s3096_s23 + $0x118] sm:$0xff] %v2231_v50  }
 0x17e   : > { %2302 = vst [vmem:[%s3096_s23 + $0x50] sm:$0xff] %v2106_v44   ;;  %v1376_v54 = vadd.f32 %v2434_v24, %v1375_v45  ;;  %v1573_v56 = vadd.f32 %v1572_v42, %v1478_v46 }
 0x17f   : > { %2326 = vst [vmem:[%s3096_s23 + $0x110] sm:$0xff] %v2226_v51  }
 0x180   : > { %v1574_v58 = vadd.f32 %v1573_v56, %v1479_v53  ;;  %v2438_v59 = vpop.f32.mrb[24].mxu0  ;;  %v1377_v61 = vadd.f32 %v2435_v35, %v1376_v54  ;;  %v3184_v0 = vpop.f32.mrb[24].mxu1 }
 0x181   : > { %v588_v62 = vpop.f32.mrb[25].mxu0  ;;  %v3186_v6 = vpop.f32.mrb[25].mxu1  ;;  %v1483_v23 = vmul.f32 %v2438_v59, %v2438_v59 }
 0x182   : > { %v1378_v1 = vadd.f32 %v1377_v61, %v588_v62  ;;  %v1481_v2 = vmul.f32 %v588_v62, %v588_v62  ;;  %v1575_v3 = vadd.f32 %v1574_v58, %v1480_v57  ;;  %v2439_v5 = vpop.f32.mrb[26].mxu0  ;;  %v3188_v11 = vpop.f32.mrb[26].mxu1 }
 0x183   : > { %v2121_v9 = vpack.c.bf16 %v2439_v5, %v2438_v59  ;;  %v591_v10 = vpop.f32.mrb[27].mxu0  ;;  %v3190_v19 = vpop.f32.mrb[27].mxu1  ;;  %v2241_v21 = vpack.c.bf16 %v3188_v11, %v3184_v0  ;;  %v1484_v27 = vmul.f32 %v2439_v5, %v2439_v5 }
 0x184   : > { %v1576_v13 = vadd.f32 %v1575_v3, %v1481_v2  ;;  %v2116_v16 = vpack.c.bf16 %v591_v10, %v588_v62  ;;  %v1379_v17 = vadd.f32 %v1378_v1, %v591_v10  ;;  %v1482_v18 = vmul.f32 %v591_v10, %v591_v10 }
 0x185   : > { %2305 = vst [vmem:[%s3096_s23 + $0x68] sm:$0xff] %v2121_v9   ;;  %v2236_v22 = vpack.c.bf16 %v3190_v19, %v3186_v6  ;;  %2329 = vst [vmem:[%s3096_s23 + $0x128] sm:$0xff] %v2241_v21  }
 0x186   : > { %2304 = vst [vmem:[%s3096_s23 + $0x60] sm:$0xff] %v2116_v16   ;;  %v1380_v24 = vadd.f32 %v2438_v59, %v1379_v17  ;;  %v1577_v25 = vadd.f32 %v1576_v13, %v1482_v18 }
 0x187   : > { %2328 = vst [vmem:[%s3096_s23 + $0x120] sm:$0xff] %v2236_v22  }
 0x188   : > { %v1578_v30 = vadd.f32 %v1577_v25, %v1483_v23  ;;  %v2442_v31 = vpop.f32.mrb[28].mxu0  ;;  %v1381_v33 = vadd.f32 %v2439_v5, %v1380_v24  ;;  %v3200_v38 = vpop.f32.mrb[28].mxu1 }
 0x189   : > { %v604_v35 = vpop.f32.mrb[29].mxu0  ;;  %v3202_v46 = vpop.f32.mrb[29].mxu1  ;;  %v1487_v1 = vmul.f32 %v2442_v31, %v2442_v31 }
 0x18a   : > { %v1382_v39 = vadd.f32 %v1381_v33, %v604_v35  ;;  %v1485_v42 = vmul.f32 %v604_v35, %v604_v35  ;;  %v1579_v44 = vadd.f32 %v1578_v30, %v1484_v27  ;;  %v2443_v45 = vpop.f32.mrb[30].mxu0  ;;  %v3204_v53 = vpop.f32.mrb[30].mxu1 }
 0x18b   : > { %v2131_v50 = vpack.c.bf16 %v2443_v45, %v2442_v31  ;;  %v607_v51 = vpop.f32.mrb[31].mxu0  ;;  %v3206_v59 = vpop.f32.mrb[31].mxu1  ;;  %v2251_v61 = vpack.c.bf16 %v3204_v53, %v3200_v38  ;;  %v1488_v5 = vmul.f32 %v2443_v45, %v2443_v45 }
 0x18c   : > { %v1580_v54 = vadd.f32 %v1579_v44, %v1485_v42  ;;  %v2126_v56 = vpack.c.bf16 %v607_v51, %v604_v35  ;;  %v1383_v57 = vadd.f32 %v1382_v39, %v607_v51  ;;  %v1486_v58 = vmul.f32 %v607_v51, %v607_v51 }
 0x18d   : > { %2307 = vst [vmem:[%s3096_s23 + $0x78] sm:$0xff] %v2131_v50   ;;  %v2246_v62 = vpack.c.bf16 %v3206_v59, %v3202_v46  ;;  %2331 = vst [vmem:[%s3096_s23 + $0x138] sm:$0xff] %v2251_v61  }
 0x18e   : > { %2306 = vst [vmem:[%s3096_s23 + $0x70] sm:$0xff] %v2126_v56   ;;  %v1384_v2 = vadd.f32 %v2442_v31, %v1383_v57  ;;  %v1581_v3 = vadd.f32 %v1580_v54, %v1486_v58 }
 0x18f   : > { %2330 = vst [vmem:[%s3096_s23 + $0x130] sm:$0xff] %v2246_v62  }
 0x190   : > { %v1582_v9 = vadd.f32 %v1581_v3, %v1487_v1  ;;  %v2446_v10 = vpop.f32.mrb[32].mxu0  ;;  %v1385_v13 = vadd.f32 %v2443_v45, %v1384_v2  ;;  %v3216_v17 = vpop.f32.mrb[32].mxu1 }
 0x191   : > { %v620_v16 = vpop.f32.mrb[33].mxu0  ;;  %v3218_v24 = vpop.f32.mrb[33].mxu1  ;;  %v1491_v50 = vmul.f32 %v2446_v10, %v2446_v10 }
 0x192   : > { %v1386_v18 = vadd.f32 %v1385_v13, %v620_v16  ;;  %v1489_v21 = vmul.f32 %v620_v16, %v620_v16  ;;  %v1583_v22 = vadd.f32 %v1582_v9, %v1488_v5  ;;  %v2447_v23 = vpop.f32.mrb[34].mxu0  ;;  %v3220_v30 = vpop.f32.mrb[34].mxu1 }
 0x193   : > { %v2141_v25 = vpack.c.bf16 %v2447_v23, %v2446_v10  ;;  %v623_v27 = vpop.f32.mrb[35].mxu0  ;;  %v3222_v42 = vpop.f32.mrb[35].mxu1  ;;  %v2261_v44 = vpack.c.bf16 %v3220_v30, %v3216_v17  ;;  %v1492_v56 = vmul.f32 %v2447_v23, %v2447_v23 }
 0x194   : > { %v1584_v31 = vadd.f32 %v1583_v22, %v1489_v21  ;;  %v2136_v33 = vpack.c.bf16 %v623_v27, %v620_v16  ;;  %v1387_v35 = vadd.f32 %v1386_v18, %v623_v27  ;;  %v1490_v39 = vmul.f32 %v623_v27, %v623_v27 }
 0x195   : > { %2309 = vst [vmem:[%s3096_s23 + $0x88] sm:$0xff] %v2141_v25   ;;  %v2256_v45 = vpack.c.bf16 %v3222_v42, %v3218_v24  ;;  %2333 = vst [vmem:[%s3096_s23 + $0x148] sm:$0xff] %v2261_v44  }
 0x196   : > { %2308 = vst [vmem:[%s3096_s23 + $0x80] sm:$0xff] %v2136_v33   ;;  %v1388_v51 = vadd.f32 %v2446_v10, %v1387_v35  ;;  %v1585_v54 = vadd.f32 %v1584_v31, %v1490_v39 }
 0x197   : > { %2332 = vst [vmem:[%s3096_s23 + $0x140] sm:$0xff] %v2256_v45  }
 0x198   : > { %v1586_v57 = vadd.f32 %v1585_v54, %v1491_v50  ;;  %v2450_v58 = vpop.f32.mrb[36].mxu0  ;;  %v1389_v61 = vadd.f32 %v2447_v23, %v1388_v51  ;;  %v3232_v1 = vpop.f32.mrb[36].mxu1 }
 0x199   : > { %v636_v62 = vpop.f32.mrb[37].mxu0  ;;  %v3234_v13 = vpop.f32.mrb[37].mxu1  ;;  %v1495_v35 = vmul.f32 %v2450_v58, %v2450_v58 }
 0x19a   : > { %v1390_v2 = vadd.f32 %v1389_v61, %v636_v62  ;;  %v1493_v3 = vmul.f32 %v636_v62, %v636_v62  ;;  %v1587_v5 = vadd.f32 %v1586_v57, %v1492_v56  ;;  %v2451_v9 = vpop.f32.mrb[38].mxu0  ;;  %v3236_v18 = vpop.f32.mrb[38].mxu1 }
 0x19b   : > { %v2151_v10 = vpack.c.bf16 %v2451_v9, %v2450_v58  ;;  %v639_v16 = vpop.f32.mrb[39].mxu0  ;;  %v3238_v27 = vpop.f32.mrb[39].mxu1  ;;  %v2271_v31 = vpack.c.bf16 %v3236_v18, %v3232_v1  ;;  %v1496_v45 = vmul.f32 %v2451_v9, %v2451_v9 }
 0x19c   : > { %v1588_v21 = vadd.f32 %v1587_v5, %v1493_v3  ;;  %v2146_v22 = vpack.c.bf16 %v639_v16, %v636_v62  ;;  %v1391_v23 = vadd.f32 %v1390_v2, %v639_v16  ;;  %v1494_v25 = vmul.f32 %v639_v16, %v639_v16 }
 0x19d   : > { %2311 = vst [vmem:[%s3096_s23 + $0x98] sm:$0xff] %v2151_v10   ;;  %v2266_v33 = vpack.c.bf16 %v3238_v27, %v3234_v13  ;;  %2335 = vst [vmem:[%s3096_s23 + $0x158] sm:$0xff] %v2271_v31  }
 0x19e   : > { %2310 = vst [vmem:[%s3096_s23 + $0x90] sm:$0xff] %v2146_v22   ;;  %v1392_v39 = vadd.f32 %v2450_v58, %v1391_v23  ;;  %v1589_v44 = vadd.f32 %v1588_v21, %v1494_v25 }
 0x19f   : > { %2334 = vst [vmem:[%s3096_s23 + $0x150] sm:$0xff] %v2266_v33  }
 0x1a0   : > { %v1590_v50 = vadd.f32 %v1589_v44, %v1495_v35  ;;  %v2454_v51 = vpop.f32.mrb[40].mxu0  ;;  %v1393_v54 = vadd.f32 %v2451_v9, %v1392_v39  ;;  %v3248_v57 = vpop.f32.mrb[40].mxu1 }
 0x1a1   : > { %v652_v56 = vpop.f32.mrb[41].mxu0  ;;  %v3250_v5 = vpop.f32.mrb[41].mxu1  ;;  %v1499_v35 = vmul.f32 %v2454_v51, %v2454_v51 }
 0x1a2   : > { %v1394_v61 = vadd.f32 %v1393_v54, %v652_v56  ;;  %v1497_v62 = vmul.f32 %v652_v56, %v652_v56  ;;  %v1591_v2 = vadd.f32 %v1590_v50, %v1496_v45  ;;  %v2455_v3 = vpop.f32.mrb[42].mxu0  ;;  %v3252_v16 = vpop.f32.mrb[42].mxu1 }
 0x1a3   : > { %v2161_v58 = vpack.c.bf16 %v2455_v3, %v2454_v51  ;;  %v655_v10 = vpop.f32.mrb[43].mxu0  ;;  %3566 = vst [vmem:[#allocation15_spill] sm:$0xff] %v3252_v16  ;;  %v3254_v25 = vpop.f32.mrb[43].mxu1  ;;  %v2281_v31 = vpack.c.bf16 %v3252_v16, %v3248_v57  ;;  %v1500_v45 = vmul.f32 %v2455_v3, %v2455_v3 }
 0x1a4   : > { %v1592_v21 = vadd.f32 %v1591_v2, %v1497_v62  ;;  %v2156_v22 = vpack.c.bf16 %v655_v10, %v652_v56  ;;  %v1395_v9 = vadd.f32 %v1394_v61, %v655_v10  ;;  %v1498_v23 = vmul.f32 %v655_v10, %v655_v10 }
 0x1a5   : > { %2313 = vst [vmem:[%s3096_s23 + $0xa8] sm:$0xff] %v2161_v58   ;;  %v2276_v33 = vpack.c.bf16 %v3254_v25, %v3250_v5  ;;  %2337 = vst [vmem:[%s3096_s23 + $0x168] sm:$0xff] %v2281_v31  }
 0x1a6   : > { %2312 = vst [vmem:[%s3096_s23 + $0xa0] sm:$0xff] %v2156_v22   ;;  %v1396_v39 = vadd.f32 %v2454_v51, %v1395_v9  ;;  %v1593_v44 = vadd.f32 %v1592_v21, %v1498_v23 }
 0x1a7   : > { %2336 = vst [vmem:[%s3096_s23 + $0x160] sm:$0xff] %v2276_v33  }
 0x1a8   : > { %v1594_v50 = vadd.f32 %v1593_v44, %v1499_v35  ;;  %v2458_v54 = vpop.f32.mrb[44].mxu0  ;;  %v1397_v56 = vadd.f32 %v2455_v3, %v1396_v39  ;;  %v3264_v62 = vpop.f32.mrb[44].mxu1 }
 0x1a9   : > { %v668_v61 = vpop.f32.mrb[45].mxu0  ;;  %v3268_v22 = vpop.f32.mrb[45].mxu1 }
 0x1aa   : > { %v1398_v2 = vadd.f32 %v1397_v56, %v668_v61  ;;  %v1501_v58 = vmul.f32 %v668_v61, %v668_v61  ;;  %v1595_v10 = vadd.f32 %v1594_v50, %v1500_v45  ;;  %v2459_v16 = vpop.f32.mrb[46].mxu0  ;;  %v3270_v9 = vpop.f32.mrb[46].mxu1  ;;  %v1503_v45 = vmul.f32 %v2458_v54, %v2458_v54 }
 0x1ab   : > { %v2171_v51 = vpack.c.bf16 %v2459_v16, %v2458_v54  ;;  %v671_v21 = vpop.f32.mrb[47].mxu0  ;;  %v3272_v35 = vpop.f32.mrb[47].mxu1  ;;  %v2291_v39 = vpack.c.bf16 %v3270_v9, %v3264_v62 }
 0x1ac   : > { %v1596_v3 = vadd.f32 %v1595_v10, %v1501_v58  ;;  %v2166_v23 = vpack.c.bf16 %v671_v21, %v668_v61  ;;  %v1399_v31 = vadd.f32 %v1398_v2, %v671_v21  ;;  %v1502_v33 = vmul.f32 %v671_v21, %v671_v21 }
 0x1ad   : > { %2315 = vst [vmem:[%s3096_s23 + $0xb8] sm:$0xff] %v2171_v51   ;;  %v2286_v44 = vpack.c.bf16 %v3272_v35, %v3268_v22  ;;  %2339 = vst [vmem:[%s3096_s23 + $0x178] sm:$0xff] %v2291_v39   ;;  %v1504_v61 = vmul.f32 %v2459_v16, %v2459_v16  ;;  %v1505_v10 = vmul.f32 %v3088_v28, %v3088_v28 }
 0x1ae   : > { %2314 = vst [vmem:[%s3096_s23 + $0xb0] sm:$0xff] %v2166_v23   ;;  %v1400_v50 = vadd.f32 %v2458_v54, %v1399_v31  ;;  %v1597_v56 = vadd.f32 %v1596_v3, %v1502_v33 }
 0x1af   : > { %2338 = vst [vmem:[%s3096_s23 + $0x170] sm:$0xff] %v2286_v44  }
 0x1b0   : > { %v1598_v2 = vadd.f32 %v1597_v56, %v1503_v45  ;;  %v1401_v58 = vadd.f32 %v2459_v16, %v1400_v50 }
 0x1b1   : > { %2679 = shalt.err (!%p2676_p7)
}
 0x1b2   : > { %s2680_s24 = scalar_lea.hbm %s3284_s6, 6144  ;;  %s2684_s21 = scalar_lea.hbm %s3547_s2, 12288 }
 0x1b3   : > { %p2681_p9 = scmp.ne.s32.totalorder %s3284_s6, %s2680_s24  ;;  %p2685_p5 = scmp.lt.u32.totalorder %s3284_s6, %s3547_s2 }
 0x1b4   : > { %p2686_p11 = scmp.lt.u32.totalorder %s2684_s21, %s2680_s24  ;;  %p2688_p4 = scmp.lt.u32.totalorder %s2680_s24, %s3284_s6 }
 0x1b5   : > { %p2682_p2 = pnand %p2681_p9, %p2927_p12 }
 0x1b6   : > { %p2687_p1 = por %p2686_p11, %p2685_p5 }
 0x1b7   : > { %p2683_p0 = pneg %p2682_p2 }
 0x1b8   : > { %p2689_p6 = por %p2688_p4, %p2687_p1 }
 0x1ba   : > { %p2690_p8 = pnand %p2689_p6, %p2683_p0 }
 0x1bc   : > { %2693 = shalt.err (!%p2690_p8)
}
 0x1bd   : > { %s2805_s29 = smov 64   ;;  %s2806_s11 = smov 4   ;;  %v1402_v16 = vadd.f32 %v1401_v58, %v3088_v28  ;;  %v1599_v54 = vadd.f32 %v1598_v2, %v1504_v61  ;;  %v1506_v3 = vmul.f32 %v3094_v37, %v3094_v37  ;;  %v1507_v23 = vmul.f32 %v3086_v26, %v3086_v26 }
 0x1be   : > { %2533 = dma.vmem_to_hbm [thread:$0]  (%p2927_p12), %s3274_s25, 6144, %s3284_s6, %s1656_s8, %s2805_s29, %s2805_s29, %s2806_s11   ;;  %v1508_v39 = vmul.f32 %v3090_v32, %v3090_v32  ;;  %v1509_v28 = vmul.f32 %v3106_v52, %v3106_v52  ;;  %v1510_v2 = vmul.f32 %v3110_v60, %v3110_v60 }
 0x1bf   : > { %v1600_v51 = vadd.f32 %v1599_v54, %v1505_v10  ;;  %v1403_v21 = vadd.f32 %v1402_v16, %v3094_v37  ;;  %s1660_s25 = sand.u32 1, %s2855_s19   ;;  %s1951_s6 = sshll.u32 %s2855_s19, 4 }
 0x1c0   : > { %s240_s8 = scalar_lea.vmem [#allocation8], %s2975_s14  ;;  %s246_s28 = scalar_lea.vmem [#allocation10], %s2975_s14 }
 0x1c1   : > { %v1404_v31 = vadd.f32 %v3086_v26, %v1403_v21  ;;  %v1601_v33 = vadd.f32 %v1600_v51, %v1506_v3  ;;  %v1511_v26 = vmul.f32 %v3104_v47, %v3104_v47  ;;  %s1693_s9 = sshll.u32 %s240_s8, 4  ;;  %s1706_s12 = sshll.u32 %s246_s28, 4  ;;  %s3468_s9 = int_to_ptr.vmem [resolvable:$true] %s1693_s9  ;;  %s3475_s12 = int_to_ptr.vmem [resolvable:$true] %s1706_s12 }
 0x1c2   : > { %s3466_s7 = scalar_lea.hbm %s3548_s3, %s1951_s6  ;;  %s3473_s21 = scalar_lea.hbm %s3549_s4, %s1951_s6 }
 0x1c3   : > { %v1602_v44 = vadd.f32 %v1601_v33, %v1507_v23  ;;  %v1405_v45 = vadd.f32 %v3090_v32, %v1404_v31  ;;  %v1512_v32 = vmul.f32 %v3108_v55, %v3108_v55  ;;  %v1514_v23 = vmul.f32 %v3126_v20, %v3126_v20  ;;  %s3477_s23 = scalar_lea.sflag [#allocation9], %s1660_s25  ;;  %s2694_s10 = scalar_lea.vmem %s3468_s9, 16 }
 0x1c4   : > { %p2695_p10 = scmp.ne.s32.totalorder %s3468_s9, %s2694_s10  ;;  %s2807_s29 = smov [#allocation8]  }
 0x1c5   : > { %v1406_v50 = vadd.f32 %v1405_v45, %v3106_v52  ;;  %v1603_v56 = vadd.f32 %v1602_v44, %v1508_v39  ;;  %v1513_v52 = vmul.f32 %v3122_v12, %v3122_v12  ;;  %s2698_s11 = sshll.u32 %s2807_s29, 4  ;;  %s2699_s11 = int_to_ptr.vmem [resolvable:$false] %s2698_s11 }
 0x1c6   : > { %p2696_p13 = pnand %p2695_p10, %p2927_p12  ;;  %s2700_s13 = scalar_lea.vmem %s2699_s11, 32 }
 0x1c7   : > { %v1604_v61 = vadd.f32 %v1603_v56, %v1509_v28  ;;  %v1407_v37 = vadd.f32 %v1406_v50, %v3110_v60  ;;  %v1518_v56 = vmul.f32 %v3142_v49, %v3142_v49  ;;  %p2701_p7 = scmp.lt.s32.totalorder %s3468_s9, %s2699_s11  ;;  %p2702_p9 = scmp.lt.s32.totalorder %s2700_s13, %s2694_s10 }
 0x1c8   : > { %p2697_p3 = pneg %p2696_p13 }
 0x1c9   : > { %v1408_v58 = vadd.f32 %v3104_v47, %v1407_v37  ;;  %v1605_v10 = vadd.f32 %v1604_v61, %v1510_v2  ;;  %v1515_v47 = vmul.f32 %v3120_v7, %v3120_v7  ;;  %p2703_p2 = por %p2702_p9, %p2701_p7 }
 0x1cb   : > { %v1606_v16 = vadd.f32 %v1605_v10, %v1511_v26  ;;  %v1409_v54 = vadd.f32 %v3108_v55, %v1408_v58  ;;  %v1516_v55 = vmul.f32 %v3124_v15, %v3124_v15  ;;  %p2704_p0 = pnand %p2703_p2, %p2697_p3 }
 0x1cd   : > { %v1410_v51 = vadd.f32 %v1409_v54, %v3122_v12  ;;  %v1607_v21 = vadd.f32 %v1606_v16, %v1512_v32  ;;  %v1517_v12 = vmul.f32 %v3138_v40, %v3138_v40  ;;  %v1522_v16 = vmul.f32 %v3158_v14, %v3158_v14 }
 0x1cf   : > { %v1608_v3 = vadd.f32 %v1607_v21, %v1513_v52  ;;  %v1411_v60 = vadd.f32 %v1410_v51, %v3126_v20 }
 0x1d1   : > { %v1412_v31 = vadd.f32 %v3120_v7, %v1411_v60  ;;  %v1609_v33 = vadd.f32 %v1608_v3, %v1514_v23  ;;  %v1519_v7 = vmul.f32 %v3136_v34, %v3136_v34 }
 0x1d3   : > { %v1610_v39 = vadd.f32 %v1609_v33, %v1515_v47  ;;  %v1413_v44 = vadd.f32 %v3124_v15, %v1412_v31  ;;  %v1520_v15 = vmul.f32 %v3140_v43, %v3140_v43  ;;  %v1526_v47 = vmul.f32 %v3174_v48, %v3174_v48 }
 0x1d5   : > { %v1414_v45 = vadd.f32 %v1413_v44, %v3138_v40  ;;  %v1611_v28 = vadd.f32 %v1610_v39, %v1516_v55  ;;  %v1521_v40 = vmul.f32 %v3154_v4, %v3154_v4 }
 0x1d7   : > { %v1612_v50 = vadd.f32 %v1611_v28, %v1517_v12  ;;  %v1415_v20 = vadd.f32 %v1414_v45, %v3142_v49  ;;  %v1530_v28 = vmul.f32 %v3190_v19, %v3190_v19 }
 0x1d9   : > { %v1416_v61 = vadd.f32 %v3136_v34, %v1415_v20  ;;  %v1613_v37 = vadd.f32 %v1612_v50, %v1518_v56  ;;  %v1523_v34 = vmul.f32 %v3152_v63, %v3152_v63 }
 0x1db   : > { %v1614_v2 = vadd.f32 %v1613_v37, %v1519_v7  ;;  %v1417_v26 = vadd.f32 %v3140_v43, %v1416_v61  ;;  %v1524_v43 = vmul.f32 %v3156_v8, %v3156_v8 }
 0x1dd   : > { %v1418_v58 = vadd.f32 %v1417_v26, %v3154_v4  ;;  %v1615_v10 = vadd.f32 %v1614_v2, %v1520_v15  ;;  %v1525_v4 = vmul.f32 %v3170_v36, %v3170_v36  ;;  %v1534_v2 = vmul.f32 %v3206_v59, %v3206_v59 }
 0x1df   : > { %v1616_v32 = vadd.f32 %v1615_v10, %v1521_v40  ;;  %v1419_v49 = vadd.f32 %v1418_v58, %v3158_v14 }
 0x1e1   : > { %v1420_v54 = vadd.f32 %v3152_v63, %v1419_v49  ;;  %v1617_v52 = vadd.f32 %v1616_v32, %v1522_v16  ;;  %v1527_v63 = vmul.f32 %v3168_v29, %v3168_v29 }
 0x1e3   : > { %v1618_v51 = vadd.f32 %v1617_v52, %v1523_v34  ;;  %v1421_v21 = vadd.f32 %v3156_v8, %v1420_v54  ;;  %v1528_v8 = vmul.f32 %v3172_v41, %v3172_v41  ;;  %v1538_v34 = vmul.f32 %v3222_v42, %v3222_v42 }
 0x1e5   : > { %v1422_v3 = vadd.f32 %v1421_v21, %v3170_v36  ;;  %v1619_v60 = vadd.f32 %v1618_v51, %v1524_v43  ;;  %v1529_v36 = vmul.f32 %v3186_v6, %v3186_v6 }
 0x1e7   : > { %v1620_v23 = vadd.f32 %v1619_v60, %v1525_v4  ;;  %v1423_v14 = vadd.f32 %v1422_v3, %v3174_v48  ;;  %v1542_v60 = vmul.f32 %v3238_v27, %v3238_v27 }
 0x1e9   : > { %v1424_v31 = vadd.f32 %v3168_v29, %v1423_v14  ;;  %v1621_v33 = vadd.f32 %v1620_v23, %v1526_v47  ;;  %v1531_v29 = vmul.f32 %v3184_v0, %v3184_v0 }
 0x1eb   : > { %v1622_v55 = vadd.f32 %v1621_v33, %v1527_v63  ;;  %v1425_v39 = vadd.f32 %v3172_v41, %v1424_v31  ;;  %v1532_v41 = vmul.f32 %v3188_v11, %v3188_v11 }
 0x1ed   : > { %v1426_v44 = vadd.f32 %v1425_v39, %v3186_v6  ;;  %v1623_v12 = vadd.f32 %v1622_v55, %v1528_v8  ;;  %v1533_v6 = vmul.f32 %v3202_v46, %v3202_v46  ;;  %v1546_v55 = vmul.f32 %v3254_v25, %v3254_v25 }
 0x1ef   : > { %v1624_v45 = vadd.f32 %v1623_v12, %v1529_v36  ;;  %v1427_v48 = vadd.f32 %v1426_v44, %v3190_v19  ;;  %v3567_v44 = vld [vmem:[#allocation15_spill] sm:$0xff] }
 0x1f1   : > { %v1428_v50 = vadd.f32 %v3184_v0, %v1427_v48  ;;  %v1625_v20 = vadd.f32 %v1624_v45, %v1530_v28  ;;  %v1535_v0 = vmul.f32 %v3200_v38, %v3200_v38 }
 0x1f3   : > { %v1626_v56 = vadd.f32 %v1625_v20, %v1531_v29  ;;  %v1429_v7 = vadd.f32 %v3188_v11, %v1428_v50  ;;  %v1536_v11 = vmul.f32 %v3204_v53, %v3204_v53  ;;  %v1551_v50 = vmul.f32 %v3264_v62, %v3264_v62 }
 0x1f5   : > { %v1430_v61 = vadd.f32 %v1429_v7, %v3202_v46  ;;  %v1627_v37 = vadd.f32 %v1626_v56, %v1532_v41  ;;  %v1537_v46 = vmul.f32 %v3218_v24, %v3218_v24  ;;  %v1552_v56 = vmul.f32 %v3270_v9, %v3270_v9 }
 0x1f7   : > { %v1628_v15 = vadd.f32 %v1627_v37, %v1533_v6  ;;  %v1431_v19 = vadd.f32 %v1430_v61, %v3206_v59 }
 0x1f9   : > { %v1432_v26 = vadd.f32 %v3200_v38, %v1431_v19  ;;  %v1629_v40 = vadd.f32 %v1628_v15, %v1534_v2  ;;  %v1539_v38 = vmul.f32 %v3216_v17, %v3216_v17 }
 0x1fb   : > { %v1630_v58 = vadd.f32 %v1629_v40, %v1535_v0  ;;  %v1433_v10 = vadd.f32 %v3204_v53, %v1432_v26  ;;  %v1540_v53 = vmul.f32 %v3220_v30, %v3220_v30 }
 0x1fd   : > { %v1434_v32 = vadd.f32 %v1433_v10, %v3218_v24  ;;  %v1631_v49 = vadd.f32 %v1630_v58, %v1536_v11  ;;  %v1541_v24 = vmul.f32 %v3234_v13, %v3234_v13 }
 0x1ff   : > { %v1632_v16 = vadd.f32 %v1631_v49, %v1537_v46  ;;  %v1435_v59 = vadd.f32 %v1434_v32, %v3222_v42 }
 0x201   : > { %v1436_v54 = vadd.f32 %v3216_v17, %v1435_v59  ;;  %v1633_v52 = vadd.f32 %v1632_v16, %v1538_v34  ;;  %v1543_v17 = vmul.f32 %v3232_v1, %v3232_v1 }
 0x203   : > { %v1634_v43 = vadd.f32 %v1633_v52, %v1539_v38  ;;  %v1437_v51 = vadd.f32 %v3220_v30, %v1436_v54  ;;  %v1544_v30 = vmul.f32 %v3236_v18, %v3236_v18 }
 0x205   : > { %v1438_v21 = vadd.f32 %v1437_v51, %v3234_v13  ;;  %v1635_v4 = vadd.f32 %v1634_v43, %v1540_v53  ;;  %v1545_v13 = vmul.f32 %v3250_v5, %v3250_v5 }
 0x207   : > { %v1636_v3 = vadd.f32 %v1635_v4, %v1541_v24  ;;  %v1439_v42 = vadd.f32 %v1438_v21, %v3238_v27 }
 0x209   : > { %v1440_v23 = vadd.f32 %v3232_v1, %v1439_v42  ;;  %v1637_v14 = vadd.f32 %v1636_v3, %v1542_v60  ;;  %v1547_v1 = vmul.f32 %v3248_v57, %v3248_v57 }
 0x20b   : > { %v1638_v47 = vadd.f32 %v1637_v14, %v1543_v17  ;;  %v1441_v63 = vadd.f32 %v3236_v18, %v1440_v23  ;;  %v1548_v18 = vmul.f32 %v3567_v44, %v3567_v44 }
 0x20d   : > { %v1442_v31 = vadd.f32 %v1441_v63, %v3250_v5  ;;  %v1639_v33 = vadd.f32 %v1638_v47, %v1544_v30  ;;  %v1549_v5 = vmul.f32 %v3268_v22, %v3268_v22 }
 0x20f   : > { %v1640_v8 = vadd.f32 %v1639_v33, %v1545_v13  ;;  %v1443_v27 = vadd.f32 %v1442_v31, %v3254_v25 }
 0x211   : > { %v1444_v39 = vadd.f32 %v3248_v57, %v1443_v27  ;;  %v1641_v36 = vadd.f32 %v1640_v8, %v1546_v55  ;;  %v1550_v57 = vmul.f32 %v3272_v35, %v3272_v35 }
 0x213   : > { %v1642_v12 = vadd.f32 %v1641_v36, %v1547_v1  ;;  %v1445_v45 = vadd.f32 %v3567_v44, %v1444_v39 }
 0x215   : > { %v1446_v48 = vadd.f32 %v1445_v45, %v3268_v22  ;;  %v1643_v28 = vadd.f32 %v1642_v12, %v1548_v18 }
 0x217   : > { %v1644_v29 = vadd.f32 %v1643_v28, %v1549_v5  ;;  %v1447_v25 = vadd.f32 %v1446_v48, %v3272_v35 }
 0x219   : > { %v1448_v20 = vadd.f32 %v3264_v62, %v1447_v25  ;;  %v1645_v41 = vadd.f32 %v1644_v29, %v1550_v57 }
 0x21b   : > { %v1449_v22 = vadd.f32 %v3270_v9, %v1448_v20  ;;  %v1646_v7 = vadd.f32 %v1645_v41, %v1551_v50 }
 0x21d   : > { %v1450_v6 = vrot.slane %v1449_v22, 4  ;;  %v1647_v61 = vadd.f32 %v1646_v7, %v1552_v56 }
 0x21f   : > { %v1451_v37 = vadd.f32 %v1450_v6, %v1449_v22  ;;  %v1648_v35 = vrot.slane %v1647_v61, 4 }
 0x221   : > { %v1452_v15 = vrot.slane %v1451_v37, 2  ;;  %v1649_v19 = vadd.f32 %v1648_v35, %v1647_v61 }
 0x223   : > { %v1453_v2 = vadd.f32 %v1452_v15, %v1451_v37  ;;  %v1650_v0 = vrot.slane %v1649_v19, 2 }
 0x225   : > { %v1454_v62 = vrot.slane %v1453_v2, 1  ;;  %v1651_v26 = vadd.f32 %v1650_v0, %v1649_v19 }
 0x227   : > { %v1652_v9 = vrot.slane %v1651_v26, 1  ;;  %v1455_v40 = vadd.f32 %v1454_v62, %v1453_v2 }
 0x229   : > { %1456 = vst [vmem:[%s240_s8] sm:$0x1] %v1455_v40  ;;  %v1653_v11 = vadd.f32 %v1652_v9, %v1651_v26 }
 0x22a   : > { %2707 = shalt.err (!%p2704_p0)
}
 0x22b   : > { %s2708_s25 = scalar_lea.hbm %s3466_s7, 16  ;;  %s2712_s24 = scalar_lea.hbm %s3548_s3, 32 }
 0x22c   : > { %p2709_p5 = scmp.ne.s32.totalorder %s3466_s7, %s2708_s25  ;;  %p2713_p4 = scmp.lt.u32.totalorder %s3466_s7, %s3548_s3 }
 0x22d   : > { %p2714_p6 = scmp.lt.u32.totalorder %s2712_s24, %s2708_s25  ;;  %p2716_p10 = scmp.lt.u32.totalorder %s2708_s25, %s3466_s7 }
 0x22e   : > { %p2710_p11 = pnand %p2709_p5, %p2927_p12 }
 0x22f   : > { %p2715_p8 = por %p2714_p6, %p2713_p4 }
 0x230   : > { %p2711_p1 = pneg %p2710_p11 }
 0x231   : > { %p2717_p13 = por %p2716_p10, %p2715_p8 }
 0x233   : > { %p2718_p3 = pnand %p2717_p13, %p2711_p1 }
 0x235   : > { %2721 = shalt.err (!%p2718_p3)
}
 0x236   : > { %2534 = dma.vmem_to_hbm [thread:$0]  (%p2927_p12), %s3468_s9, 16, %s3466_s7, %s3477_s23   ;;  %1654 = vst [vmem:[%s246_s28] sm:$0x1] %v1653_v11 }
 0x237   : > { %s2722_s10 = scalar_lea.vmem %s3475_s12, 16  ;;  %s2808_s29 = smov [#allocation10]  }
 0x238   : > { %p2723_p7 = scmp.ne.s32.totalorder %s3475_s12, %s2722_s10  ;;  %s2726_s11 = sshll.u32 %s2808_s29, 4  ;;  %s2727_s11 = int_to_ptr.vmem [resolvable:$false] %s2726_s11 }
 0x239   : > { %s2728_s13 = scalar_lea.vmem %s2727_s11, 32  ;;  %p2729_p0 = scmp.lt.s32.totalorder %s3475_s12, %s2727_s11 }
 0x23a   : > { %p2724_p9 = pnand %p2723_p7, %p2927_p12  ;;  %p2730_p5 = scmp.lt.s32.totalorder %s2728_s13, %s2722_s10 }
 0x23c   : > { %p2725_p2 = pneg %p2724_p9  ;;  %p2731_p11 = por %p2730_p5, %p2729_p0 }
 0x23e   : > { %p2732_p1 = pnand %p2731_p11, %p2725_p2 }
 0x240   : > { %2735 = shalt.err (!%p2732_p1)
}
 0x241   : > { %s2736_s14 = scalar_lea.hbm %s3473_s21, 16  ;;  %s2740_s7 = scalar_lea.hbm %s3549_s4, 32 }
 0x242   : > { %p2737_p4 = scmp.ne.s32.totalorder %s3473_s21, %s2736_s14  ;;  %p2741_p10 = scmp.lt.u32.totalorder %s3473_s21, %s3549_s4 }
 0x243   : > { %p2742_p13 = scmp.lt.u32.totalorder %s2740_s7, %s2736_s14  ;;  %p2744_p7 = scmp.lt.u32.totalorder %s2736_s14, %s3473_s21 }
 0x244   : > { %p2738_p6 = pnand %p2737_p4, %p2927_p12 }
 0x245   : > { %p2743_p3 = por %p2742_p13, %p2741_p10 }
 0x246   : > { %p2739_p8 = pneg %p2738_p6 }
 0x247   : > { %p2745_p9 = por %p2744_p7, %p2743_p3 }
 0x249   : > { %p2746_p2 = pnand %p2745_p9, %p2739_p8 }
 0x24b   : > { %2749 = shalt.err (!%p2746_p2)
}
 0x24c   : > { %2535 = dma.vmem_to_hbm [thread:$0]  (%p2927_p12), %s3475_s12, 16, %s3473_s21, %s3477_s23  }
 0x24d PF: > { %s1718_s8 = sand.u32 1, %s2784_s15   ;;  %p3568_p0 = scmp.ne.s32.totalorder %s3556_s22, 0 }
 0x24e   : > { %p3569_p5 = scmp.ge.s32.totalorder %s2796_s18, 2  ;;  %s1719_s24 = scalar_lea.sflag [#allocation4], %s1718_s8 }
 0x250   : > { %p2548_p11 = pnand %p3569_p5, %p3568_p0 }
 0x252   : > { %2775 = dma.done.wait (!%p2548_p11), %s1719_s24, 6144  }
 0x253   : > { %2777 = vsyncadd (!%p2548_p11), %s1719_s24, 4294961152  ;;  %s1727_s19 = sand.u32 1, %s1839_s20  }
 0x254   : > { %s1728_s26 = scalar_lea.sflag [#allocation9], %s1727_s19 }
 0x255   : > { %2779 = dma.done.wait (!%p2548_p11), %s1728_s26, 32  }
 0x256   : > { %2781 = vsyncadd (!%p2548_p11), %s1728_s26, 4294967264  ;;  %p22_p12 = scmp.ge.s32.totalorder %s2892_s27, 4   ;;  %s3570_s15 = smov %s2788_s16 }
 0x257   : > { %s3571_s16 = smov %s2792_s17  ;;  %s3572_s17 = smov %s2923_s30 }
 0x258   : > { %s3573_s18 = smov %s2892_s27  ;;  %24 = sbr.rel (!%p22_p12) target bundleno = 8 (0x8), region = 109 }
 0x25f   :  { %1740 = vsyncpa [#allocation3], 1 }
 0x260   :  { %1742 = vsyncpa [#allocation3 + $0x1], 1 }
 0x261   :  { %1743 = vsyncpa [#allocation6], 1 }
 0x262   :  { %1744 = vsyncpa [#allocation4], 1 }
 0x263   :  { %1746 = vsyncpa [#allocation4 + $0x1], 1 }
 0x264   :  { %1747 = vsyncpa [#allocation9], 1 }
 0x265   :  { %1749 = vsyncpa [#allocation9 + $0x1], 1 }

</bundles_post_ra>
